<compile_context>
chip_gen: v7x
topology: tpu7x:2x2x1
jax: 0.10.0
libtpu: 0.0.40
codegen_flags: <defaults>
</compile_context>

<pallas_src>
import math

import jax
import jax.numpy as jnp
from jax.experimental import pallas as pl
from jax.experimental.pallas import tpu as pltpu


def _make_bilstm_kernel(num_layers):
    """Fused bidirectional-LSTM kernel: all layers, both directions, one call."""
    n_par = 3 * num_layers  # per layer: W_x, W_h, b

    def kernel(*refs):
        # refs = [xc0, (W_x, W_h, b) * L, out, gx_scr, xc_scr * (L-1)]
        xc0_ref = refs[0]                       # (T*B, 2*F0) step-combined input
        par = refs[1:1 + n_par]
        out_ref = refs[1 + n_par]               # (T, B, 2H) float32
        gx_scr = refs[2 + n_par]                # (T*B, 8H) float32, reused per layer
        xc_scr = refs[3 + n_par:]               # per inner layer: (T*B, 4H) float32

        T, B, two_h = out_ref.shape
        H = two_h // 2
        G = 2 * H                               # per-gate width: [fwd H | bwd H]

        for layer in range(num_layers):
            w_x = par[3 * layer][...]           # (2*Fin, 8H)  matmul dtype
            w_h = par[3 * layer + 1][...]       # (2H, 8H)     matmul dtype (block-diag)
            b = par[3 * layer + 2][...]         # (1, 8H)      float32, bias_ih+bias_hh

            # ---- Hoisted input projection (both directions, bias folded, one dot).
            # Row block s of the input is [x_fwd(t=s) | x_bwd(t=T-1-s)], so gx row
            # block s already holds the x-contribution each direction needs at
            # interleaved step s.
            xc_in_ref = xc0_ref if layer == 0 else xc_scr[layer - 1]
            xc = xc_in_ref[...].astype(w_x.dtype)
            gx_scr[...] = (
                jnp.dot(xc, w_x, preferred_element_type=jnp.float32) + b
            )                                   # (T*B, 8H)

            # ---- Interleaved fwd/bwd recurrence; only W_hh @ h is on the serial
            #      chain.  Fully unrolled (T is small and static).
            h = jnp.zeros((B, G), jnp.float32)  # [h_fwd | h_bwd] on lanes
            c = jnp.zeros((B, G), jnp.float32)
            last = layer == num_layers - 1

            for s in range(T):
                r = T - 1 - s
                rec = jnp.dot(h.astype(w_h.dtype), w_h,
                              preferred_element_type=jnp.float32)      # (B, 8H)
                gates = gx_scr[s * B:(s + 1) * B, :] + rec
                # Gate lane layout: [i_f i_b | f_f f_b | g_f g_b | o_f o_b].
                i_g = jax.nn.sigmoid(gates[:, 0 * G:1 * G])
                f_g = jax.nn.sigmoid(gates[:, 1 * G:2 * G])
                g_g = jnp.tanh(gates[:, 2 * G:3 * G])
                o_g = jax.nn.sigmoid(gates[:, 3 * G:4 * G])
                c = f_g * c + i_g * g_g
                h = o_g * jnp.tanh(c)

                h_f = h[:, 0:H]                 # fwd hidden for time t = s
                h_b = h[:, H:G]                 # bwd hidden for time t = T-1-s
                if last:
                    # Final output y(t) = [h_fwd(t) | h_bwd(t)]  (PyTorch order).
                    out_ref[s, :, 0:H] = h_f
                    out_ref[r, :, H:G] = h_b
                else:
                    # Write the NEXT layer's step-combined matmul input directly:
                    # row block s = [y(s) | y(T-1-s)]
                    #             = [h_f(s), h_b(s), h_f(T-1-s), h_b(T-1-s)].
                    nxt = xc_scr[layer]
                    nxt[s * B:(s + 1) * B, 0:H] = h_f
                    nxt[r * B:(r + 1) * B, 2 * H:3 * H] = h_f
                    nxt[r * B:(r + 1) * B, H:2 * H] = h_b
                    nxt[s * B:(s + 1) * B, 3 * H:4 * H] = h_b

    return kernel


def pack_params(raw_params, matmul_dtype=jnp.bfloat16):
    """Pack raw PyTorch-style LSTM weights into the kernel layout.

    Per layer (Fin = input features, H = hidden):
      W_x : (2*Fin, 8H)  rows [0:Fin] = fwd input (time s), rows [Fin:2Fin] = bwd
                         input (time T-1-s); zero cross blocks.
      W_h : (2H, 8H)     block-diagonal: rows [0:H] -> fwd gate cols,
                         rows [H:2H] -> bwd gate cols.
      b   : (1, 8H)      bias_ih + bias_hh, float32.
    Gate column order: [i_f i_b | f_f f_b | g_f g_b | o_f o_b]  (PyTorch i,f,g,o).
    """
    packed = []
    for fwd, bwd in raw_params:
        w_ih_f, w_hh_f, b_ih_f, b_hh_f = fwd
        w_ih_b, w_hh_b, b_ih_b, b_hh_b = bwd
        H = w_hh_f.shape[1]
        fin = w_ih_f.shape[1]
        w_x = jnp.zeros((2 * fin, 8 * H), jnp.float32)
        w_h = jnp.zeros((2 * H, 8 * H), jnp.float32)
        b = jnp.zeros((1, 8 * H), jnp.float32)
        for g in range(4):
            cf = slice(g * 2 * H, g * 2 * H + H)          # fwd columns of gate g
            cb = slice(g * 2 * H + H, (g + 1) * 2 * H)    # bwd columns of gate g
            rg = slice(g * H, (g + 1) * H)                # gate-g rows in PyTorch
            w_x = w_x.at[0:fin, cf].set(w_ih_f[rg, :].T)
            w_x = w_x.at[fin:2 * fin, cb].set(w_ih_b[rg, :].T)
            w_h = w_h.at[0:H, cf].set(w_hh_f[rg, :].T)
            w_h = w_h.at[H:2 * H, cb].set(w_hh_b[rg, :].T)
            b = b.at[0, cf].set(b_ih_f[rg] + b_hh_f[rg])
            b = b.at[0, cb].set(b_ih_b[rg] + b_hh_b[rg])
        packed.append((w_x.astype(matmul_dtype), w_h.astype(matmul_dtype), b))
    return packed


def bidirectional_lstm(x_btf, raw_params, matmul_dtype=jnp.bfloat16):
    """Forward pass of BidirectionalLSTM: (B, T, n_in) -> (B, T, 2*n_hidden)."""
    B, T, F0 = x_btf.shape
    num_layers = len(raw_params)
    H = raw_params[0][0][1].shape[1]          # w_hh: (4H, H)

    packed = pack_params(raw_params, matmul_dtype)

    # Layout plumbing only (no compute, no upcast): time-major, then the
    # step-combined matmul input  xc0[s*B + b] = [x[s, b] | x[T-1-s, b]].
    x_tbf = jnp.transpose(x_btf, (1, 0, 2))                     # (T, B, F0)
    xc0 = jnp.concatenate([x_tbf, x_tbf[::-1]], axis=-1)        # (T, B, 2*F0)
    xc0 = xc0.reshape(T * B, 2 * F0)

    flat_params = []
    for w_x, w_h, b in packed:
        flat_params += [w_x, w_h, b]

    vmem_spec = pl.BlockSpec(memory_space=pltpu.MemorySpace.VMEM)

    out_tbf = pl.pallas_call(
        _make_bilstm_kernel(num_layers),
        out_shape=jax.ShapeDtypeStruct((T, B, 2 * H), jnp.float32),
        # Grid-less call: everything DMA'd once, single-buffered in VMEM.
        in_specs=[vmem_spec] * (1 + 3 * num_layers),
        out_specs=vmem_spec,
        scratch_shapes=(
            [pltpu.VMEM((T * B, 8 * H), jnp.float32)]             # gx (reused)
            + [pltpu.VMEM((T * B, 4 * H), jnp.float32)            # next-layer xc
               for _ in range(num_layers - 1)]
        ),
    )(xc0, *flat_params)

    return jnp.transpose(out_tbf, (1, 0, 2))                     # (B, T, 2H)


def init_lstm_params(key, n_in, n_hidden, num_layers=2):
    """Raw PyTorch-nn.LSTM-style parameters (f32), gate order [i, f, g, o]."""
    bound = 1.0 / math.sqrt(n_hidden)
    params = []
    in_size = n_in
    for _ in range(num_layers):
        layer = []
        for _direction in range(2):
            key, k1, k2, k3, k4 = jax.random.split(key, 5)
            w_ih = jax.random.uniform(
                k1, (4 * n_hidden, in_size), jnp.float32, -bound, bound)
            w_hh = jax.random.uniform(
                k2, (4 * n_hidden, n_hidden), jnp.float32, -bound, bound)
            b_ih = jax.random.uniform(
                k3, (4 * n_hidden,), jnp.float32, -bound, bound)
            b_hh = jax.random.uniform(
                k4, (4 * n_hidden,), jnp.float32, -bound, bound)
            layer.append((w_ih, w_hh, b_ih, b_hh))
        params.append(tuple(layer))
        in_size = 2 * n_hidden                 # next layer sees concat(fwd, bwd)
    return params


def bidirectional_lstm_reference(x_btf, raw_params):
    """Pure-JAX (XLA, f32) reference with nn.LSTM semantics, for validation."""
    B, T, _ = x_btf.shape
    x = x_btf.astype(jnp.float32)
    for layer in raw_params:
        outs = []
        for d, (w_ih, w_hh, b_ih, b_hh) in enumerate(layer):
            H = w_hh.shape[1]
            h = jnp.zeros((B, H), jnp.float32)
            c = jnp.zeros((B, H), jnp.float32)
            hs = [None] * T
            order = range(T) if d == 0 else range(T - 1, -1, -1)
            for t in order:
                gates = x[:, t, :] @ w_ih.T + h @ w_hh.T + b_ih + b_hh
                i_g = jax.nn.sigmoid(gates[:, 0 * H:1 * H])
                f_g = jax.nn.sigmoid(gates[:, 1 * H:2 * H])
                g_g = jnp.tanh(gates[:, 2 * H:3 * H])
                o_g = jax.nn.sigmoid(gates[:, 3 * H:4 * H])
                c = f_g * c + i_g * g_g
                h = o_g * jnp.tanh(c)
                hs[t] = h
            outs.append(jnp.stack(hs, axis=1))                   # (B, T, H)
        x = jnp.concatenate(outs, axis=-1)                       # (B, T, 2H)
    return x


if __name__ == "__main__":
    B, T, N_IN, N_HIDDEN, NUM_LAYERS = 2, 8, 16, 32, 2

    key = jax.random.PRNGKey(0)
    key, x_key = jax.random.split(key)
    x = jax.random.normal(x_key, (B, T, N_IN), jnp.float32)

    params = init_lstm_params(key, N_IN, N_HIDDEN, NUM_LAYERS)
    ref = bidirectional_lstm_reference(x, params)

    # Default path: bf16 MXU weights, f32 accumulation / gate math.
    out = jax.jit(bidirectional_lstm)(x, params)
    out = jax.block_until_ready(out)
    assert out.shape == (B, T, 2 * N_HIDDEN), out.shape
    assert out.dtype == jnp.float32
    max_err_bf16 = float(jnp.max(jnp.abs(out - ref)))
    assert max_err_bf16 < 5e-2, f"bf16 kernel mismatch: max abs err = {max_err_bf16}"

    # f32 parity path (exact-math validation mode).
    run_f32 = jax.jit(lambda a, p: bidirectional_lstm(a, p, matmul_dtype=jnp.float32))
    out_f32 = jax.block_until_ready(run_f32(x, params))
    max_err_f32 = float(jnp.max(jnp.abs(out_f32 - ref)))
    assert max_err_f32 < 1e-2, f"f32 kernel mismatch: max abs err = {max_err_f32}"

    print("KERNEL_OK")
</pallas_src>

<mosaic_0001>
module attributes {stable_mosaic.version = 11 : i64} {
  func.func @kernel(%arg0: memref<16x32xf32, #tpu.memory_space<vmem>>, %arg1: memref<32x256xbf16, #tpu.memory_space<vmem>>, %arg2: memref<64x256xbf16, #tpu.memory_space<vmem>>, %arg3: memref<1x256xf32, #tpu.memory_space<vmem>>, %arg4: memref<128x256xbf16, #tpu.memory_space<vmem>>, %arg5: memref<64x256xbf16, #tpu.memory_space<vmem>>, %arg6: memref<1x256xf32, #tpu.memory_space<vmem>>, %arg7: memref<8x2x64xf32, #tpu.memory_space<vmem>>, %arg8: memref<16x256xf32, #tpu.memory_space<vmem>>, %arg9: memref<16x128xf32, #tpu.memory_space<vmem>>) attributes {dimension_semantics = [], scalar_prefetch = 0 : i64, scratch_operands = 2 : i64, tpu.core_type = #tpu.core_type<tc>} {
    %c0 = arith.constant 0 : index
    %c0_0 = arith.constant 0 : index
    %0 = vector.load %arg1[%c0, %c0_0] : memref<32x256xbf16, #tpu.memory_space<vmem>>, vector<32x256xbf16>
    %c0_1 = arith.constant 0 : index
    %c0_2 = arith.constant 0 : index
    %1 = vector.load %arg2[%c0_1, %c0_2] : memref<64x256xbf16, #tpu.memory_space<vmem>>, vector<64x256xbf16>
    %c0_3 = arith.constant 0 : index
    %c0_4 = arith.constant 0 : index
    %2 = vector.load %arg3[%c0_3, %c0_4] : memref<1x256xf32, #tpu.memory_space<vmem>>, vector<1x256xf32>
    %c0_5 = arith.constant 0 : index
    %c0_6 = arith.constant 0 : index
    %3 = vector.load %arg0[%c0_5, %c0_6] : memref<16x32xf32, #tpu.memory_space<vmem>>, vector<16x32xf32>
    %4 = arith.truncf %3 : vector<16x32xf32> to vector<16x32xbf16>
    %cst = arith.constant dense<0.000000e+00> : vector<16x256xf32>
    %5 = tpu.matmul %4, %0, %cst {dimension_numbers = #tpu.dot_dimension_numbers<[1], [0], [0], [1], [0, 0, 1, 1], [], []>} : vector<16x32xbf16>, vector<32x256xbf16>, vector<16x256xf32> -> vector<16x256xf32>
    %6 = vector.broadcast %2 : vector<1x256xf32> to vector<16x256xf32>
    %7 = arith.addf %5, %6 : vector<16x256xf32>
    %c0_7 = arith.constant 0 : index
    %c0_8 = arith.constant 0 : index
    %8 = vector.load %arg8[%c0_7, %c0_8] : memref<16x256xf32, #tpu.memory_space<vmem>>, vector<16x256xf32>
    tpu.vector_store %arg8[%c0_7, %c0_8], %7 {strides = array<i32>} : memref<16x256xf32, #tpu.memory_space<vmem>>, vector<16x256xf32>,
    %cst_9 = arith.constant 0.000000e+00 : f32
    %9 = vector.broadcast %cst_9 : f32 to vector<2x64xf32>
    %cst_10 = arith.constant 0.000000e+00 : f32
    %10 = vector.broadcast %cst_10 : f32 to vector<2x64xf32>
    %11 = arith.truncf %9 : vector<2x64xf32> to vector<2x64xbf16>
    %cst_11 = arith.constant dense<0.000000e+00> : vector<2x256xf32>
    %12 = tpu.matmul %11, %1, %cst_11 {dimension_numbers = #tpu.dot_dimension_numbers<[1], [0], [0], [1], [0, 0, 1, 1], [], []>} : vector<2x64xbf16>, vector<64x256xbf16>, vector<2x256xf32> -> vector<2x256xf32>
    %c0_12 = arith.constant 0 : index
    %c0_13 = arith.constant 0 : index
    %13 = vector.load %arg8[%c0_12, %c0_13] : memref<16x256xf32, #tpu.memory_space<vmem>>, vector<2x256xf32>
    %14 = arith.addf %13, %12 : vector<2x256xf32>
    %15 = vector.extract_strided_slice %14 {offsets = [0, 0], sizes = [2, 64], strides = [1, 1]} : vector<2x256xf32> to vector<2x64xf32>
    %16 = arith.negf %15 : vector<2x64xf32>
    %17 = math.exp %16 : vector<2x64xf32>
    %cst_14 = arith.constant 1.000000e+00 : f32
    %18 = vector.broadcast %cst_14 : f32 to vector<2x64xf32>
    %19 = arith.addf %18, %17 : vector<2x64xf32>
    %20 = arith.divf %18, %19 : vector<2x64xf32>
    %21 = vector.extract_strided_slice %14 {offsets = [0, 64], sizes = [2, 64], strides = [1, 1]} : vector<2x256xf32> to vector<2x64xf32>
    %22 = arith.negf %21 : vector<2x64xf32>
    %23 = math.exp %22 : vector<2x64xf32>
    %cst_15 = arith.constant 1.000000e+00 : f32
    %24 = vector.broadcast %cst_15 : f32 to vector<2x64xf32>
    %25 = arith.addf %24, %23 : vector<2x64xf32>
    %26 = arith.divf %24, %25 : vector<2x64xf32>
    %27 = vector.extract_strided_slice %14 {offsets = [0, 128], sizes = [2, 64], strides = [1, 1]} : vector<2x256xf32> to vector<2x64xf32>
    %28 = math.tanh %27 : vector<2x64xf32>
    %29 = vector.extract_strided_slice %14 {offsets = [0, 192], sizes = [2, 64], strides = [1, 1]} : vector<2x256xf32> to vector<2x64xf32>
    %30 = arith.negf %29 : vector<2x64xf32>
    %31 = math.exp %30 : vector<2x64xf32>
    %cst_16 = arith.constant 1.000000e+00 : f32
    %32 = vector.broadcast %cst_16 : f32 to vector<2x64xf32>
    %33 = arith.addf %32, %31 : vector<2x64xf32>
    %34 = arith.divf %32, %33 : vector<2x64xf32>
    %35 = arith.mulf %26, %10 : vector<2x64xf32>
    %36 = arith.mulf %20, %28 : vector<2x64xf32>
    %37 = arith.addf %35, %36 : vector<2x64xf32>
    %38 = math.tanh %37 : vector<2x64xf32>
    %39 = arith.mulf %34, %38 : vector<2x64xf32>
    %40 = vector.extract_strided_slice %39 {offsets = [0, 0], sizes = [2, 32], strides = [1, 1]} : vector<2x64xf32> to vector<2x32xf32>
    %41 = vector.extract_strided_slice %39 {offsets = [0, 32], sizes = [2, 32], strides = [1, 1]} : vector<2x64xf32> to vector<2x32xf32>
    %c0_17 = arith.constant 0 : index
    %c0_18 = arith.constant 0 : index
    %42 = vector.load %arg9[%c0_17, %c0_18] : memref<16x128xf32, #tpu.memory_space<vmem>>, vector<2x32xf32>
    tpu.vector_store %arg9[%c0_17, %c0_18], %40 {strides = array<i32>} : memref<16x128xf32, #tpu.memory_space<vmem>>, vector<2x32xf32>,
    %c14 = arith.constant 14 : index
    %c64 = arith.constant 64 : index
    %43 = vector.load %arg9[%c14, %c64] : memref<16x128xf32, #tpu.memory_space<vmem>>, vector<2x32xf32>
    tpu.vector_store %arg9[%c14, %c64], %40 {strides = array<i32>} : memref<16x128xf32, #tpu.memory_space<vmem>>, vector<2x32xf32>,
    %c14_19 = arith.constant 14 : index
    %c32 = arith.constant 32 : index
    %44 = vector.load %arg9[%c14_19, %c32] : memref<16x128xf32, #tpu.memory_space<vmem>>, vector<2x32xf32>
    tpu.vector_store %arg9[%c14_19, %c32], %41 {strides = array<i32>} : memref<16x128xf32, #tpu.memory_space<vmem>>, vector<2x32xf32>,
    %c0_20 = arith.constant 0 : index
    %c96 = arith.constant 96 : index
    %45 = vector.load %arg9[%c0_20, %c96] : memref<16x128xf32, #tpu.memory_space<vmem>>, vector<2x32xf32>
    tpu.vector_store %arg9[%c0_20, %c96], %41 {strides = array<i32>} : memref<16x128xf32, #tpu.memory_space<vmem>>, vector<2x32xf32>,
    %46 = arith.truncf %39 : vector<2x64xf32> to vector<2x64xbf16>
    %cst_21 = arith.constant dense<0.000000e+00> : vector<2x256xf32>
    %47 = tpu.matmul %46, %1, %cst_21 {dimension_numbers = #tpu.dot_dimension_numbers<[1], [0], [0], [1], [0, 0, 1, 1], [], []>} : vector<2x64xbf16>, vector<64x256xbf16>, vector<2x256xf32> -> vector<2x256xf32>
    %c2 = arith.constant 2 : index
    %c0_22 = arith.constant 0 : index
    %48 = vector.load %arg8[%c2, %c0_22] : memref<16x256xf32, #tpu.memory_space<vmem>>, vector<2x256xf32>
    %49 = arith.addf %48, %47 : vector<2x256xf32>
    %50 = vector.extract_strided_slice %49 {offsets = [0, 0], sizes = [2, 64], strides = [1, 1]} : vector<2x256xf32> to vector<2x64xf32>
    %51 = arith.negf %50 : vector<2x64xf32>
    %52 = math.exp %51 : vector<2x64xf32>
    %cst_23 = arith.constant 1.000000e+00 : f32
    %53 = vector.broadcast %cst_23 : f32 to vector<2x64xf32>
    %54 = arith.addf %53, %52 : vector<2x64xf32>
    %55 = arith.divf %53, %54 : vector<2x64xf32>
    %56 = vector.extract_strided_slice %49 {offsets = [0, 64], sizes = [2, 64], strides = [1, 1]} : vector<2x256xf32> to vector<2x64xf32>
    %57 = arith.negf %56 : vector<2x64xf32>
    %58 = math.exp %57 : vector<2x64xf32>
    %cst_24 = arith.constant 1.000000e+00 : f32
    %59 = vector.broadcast %cst_24 : f32 to vector<2x64xf32>
    %60 = arith.addf %59, %58 : vector<2x64xf32>
    %61 = arith.divf %59, %60 : vector<2x64xf32>
    %62 = vector.extract_strided_slice %49 {offsets = [0, 128], sizes = [2, 64], strides = [1, 1]} : vector<2x256xf32> to vector<2x64xf32>
    %63 = math.tanh %62 : vector<2x64xf32>
    %64 = vector.extract_strided_slice %49 {offsets = [0, 192], sizes = [2, 64], strides = [1, 1]} : vector<2x256xf32> to vector<2x64xf32>
    %65 = arith.negf %64 : vector<2x64xf32>
    %66 = math.exp %65 : vector<2x64xf32>
    %cst_25 = arith.constant 1.000000e+00 : f32
    %67 = vector.broadcast %cst_25 : f32 to vector<2x64xf32>
    %68 = arith.addf %67, %66 : vector<2x64xf32>
    %69 = arith.divf %67, %68 : vector<2x64xf32>
    %70 = arith.mulf %61, %37 : vector<2x64xf32>
    %71 = arith.mulf %55, %63 : vector<2x64xf32>
    %72 = arith.addf %70, %71 : vector<2x64xf32>
    %73 = math.tanh %72 : vector<2x64xf32>
    %74 = arith.mulf %69, %73 : vector<2x64xf32>
    %75 = vector.extract_strided_slice %74 {offsets = [0, 0], sizes = [2, 32], strides = [1, 1]} : vector<2x64xf32> to vector<2x32xf32>
    %76 = vector.extract_strided_slice %74 {offsets = [0, 32], sizes = [2, 32], strides = [1, 1]} : vector<2x64xf32> to vector<2x32xf32>
    %c2_26 = arith.constant 2 : index
    %c0_27 = arith.constant 0 : index
    %77 = vector.load %arg9[%c2_26, %c0_27] : memref<16x128xf32, #tpu.memory_space<vmem>>, vector<2x32xf32>
    tpu.vector_store %arg9[%c2_26, %c0_27], %75 {strides = array<i32>} : memref<16x128xf32, #tpu.memory_space<vmem>>, vector<2x32xf32>,
    %c12 = arith.constant 12 : index
    %c64_28 = arith.constant 64 : index
    %78 = vector.load %arg9[%c12, %c64_28] : memref<16x128xf32, #tpu.memory_space<vmem>>, vector<2x32xf32>
    tpu.vector_store %arg9[%c12, %c64_28], %75 {strides = array<i32>} : memref<16x128xf32, #tpu.memory_space<vmem>>, vector<2x32xf32>,
    %c12_29 = arith.constant 12 : index
    %c32_30 = arith.constant 32 : index
    %79 = vector.load %arg9[%c12_29, %c32_30] : memref<16x128xf32, #tpu.memory_space<vmem>>, vector<2x32xf32>
    tpu.vector_store %arg9[%c12_29, %c32_30], %76 {strides = array<i32>} : memref<16x128xf32, #tpu.memory_space<vmem>>, vector<2x32xf32>,
    %c2_31 = arith.constant 2 : index
    %c96_32 = arith.constant 96 : index
    %80 = vector.load %arg9[%c2_31, %c96_32] : memref<16x128xf32, #tpu.memory_space<vmem>>, vector<2x32xf32>
    tpu.vector_store %arg9[%c2_31, %c96_32], %76 {strides = array<i32>} : memref<16x128xf32, #tpu.memory_space<vmem>>, vector<2x32xf32>,
    %81 = arith.truncf %74 : vector<2x64xf32> to vector<2x64xbf16>
    %cst_33 = arith.constant dense<0.000000e+00> : vector<2x256xf32>
    %82 = tpu.matmul %81, %1, %cst_33 {dimension_numbers = #tpu.dot_dimension_numbers<[1], [0], [0], [1], [0, 0, 1, 1], [], []>} : vector<2x64xbf16>, vector<64x256xbf16>, vector<2x256xf32> -> vector<2x256xf32>
    %c4 = arith.constant 4 : index
    %c0_34 = arith.constant 0 : index
    %83 = vector.load %arg8[%c4, %c0_34] : memref<16x256xf32, #tpu.memory_space<vmem>>, vector<2x256xf32>
    %84 = arith.addf %83, %82 : vector<2x256xf32>
    %85 = vector.extract_strided_slice %84 {offsets = [0, 0], sizes = [2, 64], strides = [1, 1]} : vector<2x256xf32> to vector<2x64xf32>
    %86 = arith.negf %85 : vector<2x64xf32>
    %87 = math.exp %86 : vector<2x64xf32>
    %cst_35 = arith.constant 1.000000e+00 : f32
    %88 = vector.broadcast %cst_35 : f32 to vector<2x64xf32>
    %89 = arith.addf %88, %87 : vector<2x64xf32>
    %90 = arith.divf %88, %89 : vector<2x64xf32>
    %91 = vector.extract_strided_slice %84 {offsets = [0, 64], sizes = [2, 64], strides = [1, 1]} : vector<2x256xf32> to vector<2x64xf32>
    %92 = arith.negf %91 : vector<2x64xf32>
    %93 = math.exp %92 : vector<2x64xf32>
    %cst_36 = arith.constant 1.000000e+00 : f32
    %94 = vector.broadcast %cst_36 : f32 to vector<2x64xf32>
    %95 = arith.addf %94, %93 : vector<2x64xf32>
    %96 = arith.divf %94, %95 : vector<2x64xf32>
    %97 = vector.extract_strided_slice %84 {offsets = [0, 128], sizes = [2, 64], strides = [1, 1]} : vector<2x256xf32> to vector<2x64xf32>
    %98 = math.tanh %97 : vector<2x64xf32>
    %99 = vector.extract_strided_slice %84 {offsets = [0, 192], sizes = [2, 64], strides = [1, 1]} : vector<2x256xf32> to vector<2x64xf32>
    %100 = arith.negf %99 : vector<2x64xf32>
    %101 = math.exp %100 : vector<2x64xf32>
    %cst_37 = arith.constant 1.000000e+00 : f32
    %102 = vector.broadcast %cst_37 : f32 to vector<2x64xf32>
    %103 = arith.addf %102, %101 : vector<2x64xf32>
    %104 = arith.divf %102, %103 : vector<2x64xf32>
    %105 = arith.mulf %96, %72 : vector<2x64xf32>
    %106 = arith.mulf %90, %98 : vector<2x64xf32>
    %107 = arith.addf %105, %106 : vector<2x64xf32>
    %108 = math.tanh %107 : vector<2x64xf32>
    %109 = arith.mulf %104, %108 : vector<2x64xf32>
    %110 = vector.extract_strided_slice %109 {offsets = [0, 0], sizes = [2, 32], strides = [1, 1]} : vector<2x64xf32> to vector<2x32xf32>
    %111 = vector.extract_strided_slice %109 {offsets = [0, 32], sizes = [2, 32], strides = [1, 1]} : vector<2x64xf32> to vector<2x32xf32>
    %c4_38 = arith.constant 4 : index
    %c0_39 = arith.constant 0 : index
    %112 = vector.load %arg9[%c4_38, %c0_39] : memref<16x128xf32, #tpu.memory_space<vmem>>, vector<2x32xf32>
    tpu.vector_store %arg9[%c4_38, %c0_39], %110 {strides = array<i32>} : memref<16x128xf32, #tpu.memory_space<vmem>>, vector<2x32xf32>,
    %c10 = arith.constant 10 : index
    %c64_40 = arith.constant 64 : index
    %113 = vector.load %arg9[%c10, %c64_40] : memref<16x128xf32, #tpu.memory_space<vmem>>, vector<2x32xf32>
    tpu.vector_store %arg9[%c10, %c64_40], %110 {strides = array<i32>} : memref<16x128xf32, #tpu.memory_space<vmem>>, vector<2x32xf32>,
    %c10_41 = arith.constant 10 : index
    %c32_42 = arith.constant 32 : index
    %114 = vector.load %arg9[%c10_41, %c32_42] : memref<16x128xf32, #tpu.memory_space<vmem>>, vector<2x32xf32>
    tpu.vector_store %arg9[%c10_41, %c32_42], %111 {strides = array<i32>} : memref<16x128xf32, #tpu.memory_space<vmem>>, vector<2x32xf32>,
    %c4_43 = arith.constant 4 : index
    %c96_44 = arith.constant 96 : index
    %115 = vector.load %arg9[%c4_43, %c96_44] : memref<16x128xf32, #tpu.memory_space<vmem>>, vector<2x32xf32>
    tpu.vector_store %arg9[%c4_43, %c96_44], %111 {strides = array<i32>} : memref<16x128xf32, #tpu.memory_space<vmem>>, vector<2x32xf32>,
    %116 = arith.truncf %109 : vector<2x64xf32> to vector<2x64xbf16>
    %cst_45 = arith.constant dense<0.000000e+00> : vector<2x256xf32>
    %117 = tpu.matmul %116, %1, %cst_45 {dimension_numbers = #tpu.dot_dimension_numbers<[1], [0], [0], [1], [0, 0, 1, 1], [], []>} : vector<2x64xbf16>, vector<64x256xbf16>, vector<2x256xf32> -> vector<2x256xf32>
    %c6 = arith.constant 6 : index
    %c0_46 = arith.constant 0 : index
    %118 = vector.load %arg8[%c6, %c0_46] : memref<16x256xf32, #tpu.memory_space<vmem>>, vector<2x256xf32>
    %119 = arith.addf %118, %117 : vector<2x256xf32>
    %120 = vector.extract_strided_slice %119 {offsets = [0, 0], sizes = [2, 64], strides = [1, 1]} : vector<2x256xf32> to vector<2x64xf32>
    %121 = arith.negf %120 : vector<2x64xf32>
    %122 = math.exp %121 : vector<2x64xf32>
    %cst_47 = arith.constant 1.000000e+00 : f32
    %123 = vector.broadcast %cst_47 : f32 to vector<2x64xf32>
    %124 = arith.addf %123, %122 : vector<2x64xf32>
    %125 = arith.divf %123, %124 : vector<2x64xf32>
    %126 = vector.extract_strided_slice %119 {offsets = [0, 64], sizes = [2, 64], strides = [1, 1]} : vector<2x256xf32> to vector<2x64xf32>
    %127 = arith.negf %126 : vector<2x64xf32>
    %128 = math.exp %127 : vector<2x64xf32>
    %cst_48 = arith.constant 1.000000e+00 : f32
    %129 = vector.broadcast %cst_48 : f32 to vector<2x64xf32>
    %130 = arith.addf %129, %128 : vector<2x64xf32>
    %131 = arith.divf %129, %130 : vector<2x64xf32>
    %132 = vector.extract_strided_slice %119 {offsets = [0, 128], sizes = [2, 64], strides = [1, 1]} : vector<2x256xf32> to vector<2x64xf32>
    %133 = math.tanh %132 : vector<2x64xf32>
    %134 = vector.extract_strided_slice %119 {offsets = [0, 192], sizes = [2, 64], strides = [1, 1]} : vector<2x256xf32> to vector<2x64xf32>
    %135 = arith.negf %134 : vector<2x64xf32>
    %136 = math.exp %135 : vector<2x64xf32>
    %cst_49 = arith.constant 1.000000e+00 : f32
    %137 = vector.broadcast %cst_49 : f32 to vector<2x64xf32>
    %138 = arith.addf %137, %136 : vector<2x64xf32>
    %139 = arith.divf %137, %138 : vector<2x64xf32>
    %140 = arith.mulf %131, %107 : vector<2x64xf32>
    %141 = arith.mulf %125, %133 : vector<2x64xf32>
    %142 = arith.addf %140, %141 : vector<2x64xf32>
    %143 = math.tanh %142 : vector<2x64xf32>
    %144 = arith.mulf %139, %143 : vector<2x64xf32>
    %145 = vector.extract_strided_slice %144 {offsets = [0, 0], sizes = [2, 32], strides = [1, 1]} : vector<2x64xf32> to vector<2x32xf32>
    %146 = vector.extract_strided_slice %144 {offsets = [0, 32], sizes = [2, 32], strides = [1, 1]} : vector<2x64xf32> to vector<2x32xf32>
    %c6_50 = arith.constant 6 : index
    %c0_51 = arith.constant 0 : index
    %147 = vector.load %arg9[%c6_50, %c0_51] : memref<16x128xf32, #tpu.memory_space<vmem>>, vector<2x32xf32>
    tpu.vector_store %arg9[%c6_50, %c0_51], %145 {strides = array<i32>} : memref<16x128xf32, #tpu.memory_space<vmem>>, vector<2x32xf32>,
    %c8 = arith.constant 8 : index
    %c64_52 = arith.constant 64 : index
    %148 = vector.load %arg9[%c8, %c64_52] : memref<16x128xf32, #tpu.memory_space<vmem>>, vector<2x32xf32>
    tpu.vector_store %arg9[%c8, %c64_52], %145 {strides = array<i32>} : memref<16x128xf32, #tpu.memory_space<vmem>>, vector<2x32xf32>,
    %c8_53 = arith.constant 8 : index
    %c32_54 = arith.constant 32 : index
    %149 = vector.load %arg9[%c8_53, %c32_54] : memref<16x128xf32, #tpu.memory_space<vmem>>, vector<2x32xf32>
    tpu.vector_store %arg9[%c8_53, %c32_54], %146 {strides = array<i32>} : memref<16x128xf32, #tpu.memory_space<vmem>>, vector<2x32xf32>,
    %c6_55 = arith.constant 6 : index
    %c96_56 = arith.constant 96 : index
    %150 = vector.load %arg9[%c6_55, %c96_56] : memref<16x128xf32, #tpu.memory_space<vmem>>, vector<2x32xf32>
    tpu.vector_store %arg9[%c6_55, %c96_56], %146 {strides = array<i32>} : memref<16x128xf32, #tpu.memory_space<vmem>>, vector<2x32xf32>,
    %151 = arith.truncf %144 : vector<2x64xf32> to vector<2x64xbf16>
    %cst_57 = arith.constant dense<0.000000e+00> : vector<2x256xf32>
    %152 = tpu.matmul %151, %1, %cst_57 {dimension_numbers = #tpu.dot_dimension_numbers<[1], [0], [0], [1], [0, 0, 1, 1], [], []>} : vector<2x64xbf16>, vector<64x256xbf16>, vector<2x256xf32> -> vector<2x256xf32>
    %c8_58 = arith.constant 8 : index
    %c0_59 = arith.constant 0 : index
    %153 = vector.load %arg8[%c8_58, %c0_59] : memref<16x256xf32, #tpu.memory_space<vmem>>, vector<2x256xf32>
    %154 = arith.addf %153, %152 : vector<2x256xf32>
    %155 = vector.extract_strided_slice %154 {offsets = [0, 0], sizes = [2, 64], strides = [1, 1]} : vector<2x256xf32> to vector<2x64xf32>
    %156 = arith.negf %155 : vector<2x64xf32>
    %157 = math.exp %156 : vector<2x64xf32>
    %cst_60 = arith.constant 1.000000e+00 : f32
    %158 = vector.broadcast %cst_60 : f32 to vector<2x64xf32>
    %159 = arith.addf %158, %157 : vector<2x64xf32>
    %160 = arith.divf %158, %159 : vector<2x64xf32>
    %161 = vector.extract_strided_slice %154 {offsets = [0, 64], sizes = [2, 64], strides = [1, 1]} : vector<2x256xf32> to vector<2x64xf32>
    %162 = arith.negf %161 : vector<2x64xf32>
    %163 = math.exp %162 : vector<2x64xf32>
    %cst_61 = arith.constant 1.000000e+00 : f32
    %164 = vector.broadcast %cst_61 : f32 to vector<2x64xf32>
    %165 = arith.addf %164, %163 : vector<2x64xf32>
    %166 = arith.divf %164, %165 : vector<2x64xf32>
    %167 = vector.extract_strided_slice %154 {offsets = [0, 128], sizes = [2, 64], strides = [1, 1]} : vector<2x256xf32> to vector<2x64xf32>
    %168 = math.tanh %167 : vector<2x64xf32>
    %169 = vector.extract_strided_slice %154 {offsets = [0, 192], sizes = [2, 64], strides = [1, 1]} : vector<2x256xf32> to vector<2x64xf32>
    %170 = arith.negf %169 : vector<2x64xf32>
    %171 = math.exp %170 : vector<2x64xf32>
    %cst_62 = arith.constant 1.000000e+00 : f32
    %172 = vector.broadcast %cst_62 : f32 to vector<2x64xf32>
    %173 = arith.addf %172, %171 : vector<2x64xf32>
    %174 = arith.divf %172, %173 : vector<2x64xf32>
    %175 = arith.mulf %166, %142 : vector<2x64xf32>
    %176 = arith.mulf %160, %168 : vector<2x64xf32>
    %177 = arith.addf %175, %176 : vector<2x64xf32>
    %178 = math.tanh %177 : vector<2x64xf32>
    %179 = arith.mulf %174, %178 : vector<2x64xf32>
    %180 = vector.extract_strided_slice %179 {offsets = [0, 0], sizes = [2, 32], strides = [1, 1]} : vector<2x64xf32> to vector<2x32xf32>
    %181 = vector.extract_strided_slice %179 {offsets = [0, 32], sizes = [2, 32], strides = [1, 1]} : vector<2x64xf32> to vector<2x32xf32>
    %c8_63 = arith.constant 8 : index
    %c0_64 = arith.constant 0 : index
    %182 = vector.load %arg9[%c8_63, %c0_64] : memref<16x128xf32, #tpu.memory_space<vmem>>, vector<2x32xf32>
    tpu.vector_store %arg9[%c8_63, %c0_64], %180 {strides = array<i32>} : memref<16x128xf32, #tpu.memory_space<vmem>>, vector<2x32xf32>,
    %c6_65 = arith.constant 6 : index
    %c64_66 = arith.constant 64 : index
    %183 = vector.load %arg9[%c6_65, %c64_66] : memref<16x128xf32, #tpu.memory_space<vmem>>, vector<2x32xf32>
    tpu.vector_store %arg9[%c6_65, %c64_66], %180 {strides = array<i32>} : memref<16x128xf32, #tpu.memory_space<vmem>>, vector<2x32xf32>,
    %c6_67 = arith.constant 6 : index
    %c32_68 = arith.constant 32 : index
    %184 = vector.load %arg9[%c6_67, %c32_68] : memref<16x128xf32, #tpu.memory_space<vmem>>, vector<2x32xf32>
    tpu.vector_store %arg9[%c6_67, %c32_68], %181 {strides = array<i32>} : memref<16x128xf32, #tpu.memory_space<vmem>>, vector<2x32xf32>,
    %c8_69 = arith.constant 8 : index
    %c96_70 = arith.constant 96 : index
    %185 = vector.load %arg9[%c8_69, %c96_70] : memref<16x128xf32, #tpu.memory_space<vmem>>, vector<2x32xf32>
    tpu.vector_store %arg9[%c8_69, %c96_70], %181 {strides = array<i32>} : memref<16x128xf32, #tpu.memory_space<vmem>>, vector<2x32xf32>,
    %186 = arith.truncf %179 : vector<2x64xf32> to vector<2x64xbf16>
    %cst_71 = arith.constant dense<0.000000e+00> : vector<2x256xf32>
    %187 = tpu.matmul %186, %1, %cst_71 {dimension_numbers = #tpu.dot_dimension_numbers<[1], [0], [0], [1], [0, 0, 1, 1], [], []>} : vector<2x64xbf16>, vector<64x256xbf16>, vector<2x256xf32> -> vector<2x256xf32>
    %c10_72 = arith.constant 10 : index
    %c0_73 = arith.constant 0 : index
    %188 = vector.load %arg8[%c10_72, %c0_73] : memref<16x256xf32, #tpu.memory_space<vmem>>, vector<2x256xf32>
    %189 = arith.addf %188, %187 : vector<2x256xf32>
    %190 = vector.extract_strided_slice %189 {offsets = [0, 0], sizes = [2, 64], strides = [1, 1]} : vector<2x256xf32> to vector<2x64xf32>
    %191 = arith.negf %190 : vector<2x64xf32>
    %192 = math.exp %191 : vector<2x64xf32>
    %cst_74 = arith.constant 1.000000e+00 : f32
    %193 = vector.broadcast %cst_74 : f32 to vector<2x64xf32>
    %194 = arith.addf %193, %192 : vector<2x64xf32>
    %195 = arith.divf %193, %194 : vector<2x64xf32>
    %196 = vector.extract_strided_slice %189 {offsets = [0, 64], sizes = [2, 64], strides = [1, 1]} : vector<2x256xf32> to vector<2x64xf32>
    %197 = arith.negf %196 : vector<2x64xf32>
    %198 = math.exp %197 : vector<2x64xf32>
    %cst_75 = arith.constant 1.000000e+00 : f32
    %199 = vector.broadcast %cst_75 : f32 to vector<2x64xf32>
    %200 = arith.addf %199, %198 : vector<2x64xf32>
    %201 = arith.divf %199, %200 : vector<2x64xf32>
    %202 = vector.extract_strided_slice %189 {offsets = [0, 128], sizes = [2, 64], strides = [1, 1]} : vector<2x256xf32> to vector<2x64xf32>
    %203 = math.tanh %202 : vector<2x64xf32>
    %204 = vector.extract_strided_slice %189 {offsets = [0, 192], sizes = [2, 64], strides = [1, 1]} : vector<2x256xf32> to vector<2x64xf32>
    %205 = arith.negf %204 : vector<2x64xf32>
    %206 = math.exp %205 : vector<2x64xf32>
    %cst_76 = arith.constant 1.000000e+00 : f32
    %207 = vector.broadcast %cst_76 : f32 to vector<2x64xf32>
    %208 = arith.addf %207, %206 : vector<2x64xf32>
    %209 = arith.divf %207, %208 : vector<2x64xf32>
    %210 = arith.mulf %201, %177 : vector<2x64xf32>
    %211 = arith.mulf %195, %203 : vector<2x64xf32>
    %212 = arith.addf %210, %211 : vector<2x64xf32>
    %213 = math.tanh %212 : vector<2x64xf32>
    %214 = arith.mulf %209, %213 : vector<2x64xf32>
    %215 = vector.extract_strided_slice %214 {offsets = [0, 0], sizes = [2, 32], strides = [1, 1]} : vector<2x64xf32> to vector<2x32xf32>
    %216 = vector.extract_strided_slice %214 {offsets = [0, 32], sizes = [2, 32], strides = [1, 1]} : vector<2x64xf32> to vector<2x32xf32>
    %c10_77 = arith.constant 10 : index
    %c0_78 = arith.constant 0 : index
    %217 = vector.load %arg9[%c10_77, %c0_78] : memref<16x128xf32, #tpu.memory_space<vmem>>, vector<2x32xf32>
    tpu.vector_store %arg9[%c10_77, %c0_78], %215 {strides = array<i32>} : memref<16x128xf32, #tpu.memory_space<vmem>>, vector<2x32xf32>,
    %c4_79 = arith.constant 4 : index
    %c64_80 = arith.constant 64 : index
    %218 = vector.load %arg9[%c4_79, %c64_80] : memref<16x128xf32, #tpu.memory_space<vmem>>, vector<2x32xf32>
    tpu.vector_store %arg9[%c4_79, %c64_80], %215 {strides = array<i32>} : memref<16x128xf32, #tpu.memory_space<vmem>>, vector<2x32xf32>,
    %c4_81 = arith.constant 4 : index
    %c32_82 = arith.constant 32 : index
    %219 = vector.load %arg9[%c4_81, %c32_82] : memref<16x128xf32, #tpu.memory_space<vmem>>, vector<2x32xf32>
    tpu.vector_store %arg9[%c4_81, %c32_82], %216 {strides = array<i32>} : memref<16x128xf32, #tpu.memory_space<vmem>>, vector<2x32xf32>,
    %c10_83 = arith.constant 10 : index
    %c96_84 = arith.constant 96 : index
    %220 = vector.load %arg9[%c10_83, %c96_84] : memref<16x128xf32, #tpu.memory_space<vmem>>, vector<2x32xf32>
    tpu.vector_store %arg9[%c10_83, %c96_84], %216 {strides = array<i32>} : memref<16x128xf32, #tpu.memory_space<vmem>>, vector<2x32xf32>,
    %221 = arith.truncf %214 : vector<2x64xf32> to vector<2x64xbf16>
    %cst_85 = arith.constant dense<0.000000e+00> : vector<2x256xf32>
    %222 = tpu.matmul %221, %1, %cst_85 {dimension_numbers = #tpu.dot_dimension_numbers<[1], [0], [0], [1], [0, 0, 1, 1], [], []>} : vector<2x64xbf16>, vector<64x256xbf16>, vector<2x256xf32> -> vector<2x256xf32>
    %c12_86 = arith.constant 12 : index
    %c0_87 = arith.constant 0 : index
    %223 = vector.load %arg8[%c12_86, %c0_87] : memref<16x256xf32, #tpu.memory_space<vmem>>, vector<2x256xf32>
    %224 = arith.addf %223, %222 : vector<2x256xf32>
    %225 = vector.extract_strided_slice %224 {offsets = [0, 0], sizes = [2, 64], strides = [1, 1]} : vector<2x256xf32> to vector<2x64xf32>
    %226 = arith.negf %225 : vector<2x64xf32>
    %227 = math.exp %226 : vector<2x64xf32>
    %cst_88 = arith.constant 1.000000e+00 : f32
    %228 = vector.broadcast %cst_88 : f32 to vector<2x64xf32>
    %229 = arith.addf %228, %227 : vector<2x64xf32>
    %230 = arith.divf %228, %229 : vector<2x64xf32>
    %231 = vector.extract_strided_slice %224 {offsets = [0, 64], sizes = [2, 64], strides = [1, 1]} : vector<2x256xf32> to vector<2x64xf32>
    %232 = arith.negf %231 : vector<2x64xf32>
    %233 = math.exp %232 : vector<2x64xf32>
    %cst_89 = arith.constant 1.000000e+00 : f32
    %234 = vector.broadcast %cst_89 : f32 to vector<2x64xf32>
    %235 = arith.addf %234, %233 : vector<2x64xf32>
    %236 = arith.divf %234, %235 : vector<2x64xf32>
    %237 = vector.extract_strided_slice %224 {offsets = [0, 128], sizes = [2, 64], strides = [1, 1]} : vector<2x256xf32> to vector<2x64xf32>
    %238 = math.tanh %237 : vector<2x64xf32>
    %239 = vector.extract_strided_slice %224 {offsets = [0, 192], sizes = [2, 64], strides = [1, 1]} : vector<2x256xf32> to vector<2x64xf32>
    %240 = arith.negf %239 : vector<2x64xf32>
    %241 = math.exp %240 : vector<2x64xf32>
    %cst_90 = arith.constant 1.000000e+00 : f32
    %242 = vector.broadcast %cst_90 : f32 to vector<2x64xf32>
    %243 = arith.addf %242, %241 : vector<2x64xf32>
    %244 = arith.divf %242, %243 : vector<2x64xf32>
    %245 = arith.mulf %236, %212 : vector<2x64xf32>
    %246 = arith.mulf %230, %238 : vector<2x64xf32>
    %247 = arith.addf %245, %246 : vector<2x64xf32>
    %248 = math.tanh %247 : vector<2x64xf32>
    %249 = arith.mulf %244, %248 : vector<2x64xf32>
    %250 = vector.extract_strided_slice %249 {offsets = [0, 0], sizes = [2, 32], strides = [1, 1]} : vector<2x64xf32> to vector<2x32xf32>
    %251 = vector.extract_strided_slice %249 {offsets = [0, 32], sizes = [2, 32], strides = [1, 1]} : vector<2x64xf32> to vector<2x32xf32>
    %c12_91 = arith.constant 12 : index
    %c0_92 = arith.constant 0 : index
    %252 = vector.load %arg9[%c12_91, %c0_92] : memref<16x128xf32, #tpu.memory_space<vmem>>, vector<2x32xf32>
    tpu.vector_store %arg9[%c12_91, %c0_92], %250 {strides = array<i32>} : memref<16x128xf32, #tpu.memory_space<vmem>>, vector<2x32xf32>,
    %c2_93 = arith.constant 2 : index
    %c64_94 = arith.constant 64 : index
    %253 = vector.load %arg9[%c2_93, %c64_94] : memref<16x128xf32, #tpu.memory_space<vmem>>, vector<2x32xf32>
    tpu.vector_store %arg9[%c2_93, %c64_94], %250 {strides = array<i32>} : memref<16x128xf32, #tpu.memory_space<vmem>>, vector<2x32xf32>,
    %c2_95 = arith.constant 2 : index
    %c32_96 = arith.constant 32 : index
    %254 = vector.load %arg9[%c2_95, %c32_96] : memref<16x128xf32, #tpu.memory_space<vmem>>, vector<2x32xf32>
    tpu.vector_store %arg9[%c2_95, %c32_96], %251 {strides = array<i32>} : memref<16x128xf32, #tpu.memory_space<vmem>>, vector<2x32xf32>,
    %c12_97 = arith.constant 12 : index
    %c96_98 = arith.constant 96 : index
    %255 = vector.load %arg9[%c12_97, %c96_98] : memref<16x128xf32, #tpu.memory_space<vmem>>, vector<2x32xf32>
    tpu.vector_store %arg9[%c12_97, %c96_98], %251 {strides = array<i32>} : memref<16x128xf32, #tpu.memory_space<vmem>>, vector<2x32xf32>,
    %256 = arith.truncf %249 : vector<2x64xf32> to vector<2x64xbf16>
    %cst_99 = arith.constant dense<0.000000e+00> : vector<2x256xf32>
    %257 = tpu.matmul %256, %1, %cst_99 {dimension_numbers = #tpu.dot_dimension_numbers<[1], [0], [0], [1], [0, 0, 1, 1], [], []>} : vector<2x64xbf16>, vector<64x256xbf16>, vector<2x256xf32> -> vector<2x256xf32>
    %c14_100 = arith.constant 14 : index
    %c0_101 = arith.constant 0 : index
    %258 = vector.load %arg8[%c14_100, %c0_101] : memref<16x256xf32, #tpu.memory_space<vmem>>, vector<2x256xf32>
    %259 = arith.addf %258, %257 : vector<2x256xf32>
    %260 = vector.extract_strided_slice %259 {offsets = [0, 0], sizes = [2, 64], strides = [1, 1]} : vector<2x256xf32> to vector<2x64xf32>
    %261 = arith.negf %260 : vector<2x64xf32>
    %262 = math.exp %261 : vector<2x64xf32>
    %cst_102 = arith.constant 1.000000e+00 : f32
    %263 = vector.broadcast %cst_102 : f32 to vector<2x64xf32>
    %264 = arith.addf %263, %262 : vector<2x64xf32>
    %265 = arith.divf %263, %264 : vector<2x64xf32>
    %266 = vector.extract_strided_slice %259 {offsets = [0, 64], sizes = [2, 64], strides = [1, 1]} : vector<2x256xf32> to vector<2x64xf32>
    %267 = arith.negf %266 : vector<2x64xf32>
    %268 = math.exp %267 : vector<2x64xf32>
    %cst_103 = arith.constant 1.000000e+00 : f32
    %269 = vector.broadcast %cst_103 : f32 to vector<2x64xf32>
    %270 = arith.addf %269, %268 : vector<2x64xf32>
    %271 = arith.divf %269, %270 : vector<2x64xf32>
    %272 = vector.extract_strided_slice %259 {offsets = [0, 128], sizes = [2, 64], strides = [1, 1]} : vector<2x256xf32> to vector<2x64xf32>
    %273 = math.tanh %272 : vector<2x64xf32>
    %274 = vector.extract_strided_slice %259 {offsets = [0, 192], sizes = [2, 64], strides = [1, 1]} : vector<2x256xf32> to vector<2x64xf32>
    %275 = arith.negf %274 : vector<2x64xf32>
    %276 = math.exp %275 : vector<2x64xf32>
    %cst_104 = arith.constant 1.000000e+00 : f32
    %277 = vector.broadcast %cst_104 : f32 to vector<2x64xf32>
    %278 = arith.addf %277, %276 : vector<2x64xf32>
    %279 = arith.divf %277, %278 : vector<2x64xf32>
    %280 = arith.mulf %271, %247 : vector<2x64xf32>
    %281 = arith.mulf %265, %273 : vector<2x64xf32>
    %282 = arith.addf %280, %281 : vector<2x64xf32>
    %283 = math.tanh %282 : vector<2x64xf32>
    %284 = arith.mulf %279, %283 : vector<2x64xf32>
    %285 = vector.extract_strided_slice %284 {offsets = [0, 0], sizes = [2, 32], strides = [1, 1]} : vector<2x64xf32> to vector<2x32xf32>
    %286 = vector.extract_strided_slice %284 {offsets = [0, 32], sizes = [2, 32], strides = [1, 1]} : vector<2x64xf32> to vector<2x32xf32>
    %c14_105 = arith.constant 14 : index
    %c0_106 = arith.constant 0 : index
    %287 = vector.load %arg9[%c14_105, %c0_106] : memref<16x128xf32, #tpu.memory_space<vmem>>, vector<2x32xf32>
    tpu.vector_store %arg9[%c14_105, %c0_106], %285 {strides = array<i32>} : memref<16x128xf32, #tpu.memory_space<vmem>>, vector<2x32xf32>,
    %c0_107 = arith.constant 0 : index
    %c64_108 = arith.constant 64 : index
    %288 = vector.load %arg9[%c0_107, %c64_108] : memref<16x128xf32, #tpu.memory_space<vmem>>, vector<2x32xf32>
    tpu.vector_store %arg9[%c0_107, %c64_108], %285 {strides = array<i32>} : memref<16x128xf32, #tpu.memory_space<vmem>>, vector<2x32xf32>,
    %c0_109 = arith.constant 0 : index
    %c32_110 = arith.constant 32 : index
    %289 = vector.load %arg9[%c0_109, %c32_110] : memref<16x128xf32, #tpu.memory_space<vmem>>, vector<2x32xf32>
    tpu.vector_store %arg9[%c0_109, %c32_110], %286 {strides = array<i32>} : memref<16x128xf32, #tpu.memory_space<vmem>>, vector<2x32xf32>,
    %c14_111 = arith.constant 14 : index
    %c96_112 = arith.constant 96 : index
    %290 = vector.load %arg9[%c14_111, %c96_112] : memref<16x128xf32, #tpu.memory_space<vmem>>, vector<2x32xf32>
    tpu.vector_store %arg9[%c14_111, %c96_112], %286 {strides = array<i32>} : memref<16x128xf32, #tpu.memory_space<vmem>>, vector<2x32xf32>,
    %c0_113 = arith.constant 0 : index
    %c0_114 = arith.constant 0 : index
    %291 = vector.load %arg4[%c0_113, %c0_114] : memref<128x256xbf16, #tpu.memory_space<vmem>>, vector<128x256xbf16>
    %c0_115 = arith.constant 0 : index
    %c0_116 = arith.constant 0 : index
    %292 = vector.load %arg5[%c0_115, %c0_116] : memref<64x256xbf16, #tpu.memory_space<vmem>>, vector<64x256xbf16>
    %c0_117 = arith.constant 0 : index
    %c0_118 = arith.constant 0 : index
    %293 = vector.load %arg6[%c0_117, %c0_118] : memref<1x256xf32, #tpu.memory_space<vmem>>, vector<1x256xf32>
    %c0_119 = arith.constant 0 : index
    %c0_120 = arith.constant 0 : index
    %294 = vector.load %arg9[%c0_119, %c0_120] : memref<16x128xf32, #tpu.memory_space<vmem>>, vector<16x128xf32>
    %295 = arith.truncf %294 : vector<16x128xf32> to vector<16x128xbf16>
    %cst_121 = arith.constant dense<0.000000e+00> : vector<16x256xf32>
    %296 = tpu.matmul %295, %291, %cst_121 {dimension_numbers = #tpu.dot_dimension_numbers<[1], [0], [0], [1], [0, 0, 1, 1], [], []>} : vector<16x128xbf16>, vector<128x256xbf16>, vector<16x256xf32> -> vector<16x256xf32>
    %297 = vector.broadcast %293 : vector<1x256xf32> to vector<16x256xf32>
    %298 = arith.addf %296, %297 : vector<16x256xf32>
    %c0_122 = arith.constant 0 : index
    %c0_123 = arith.constant 0 : index
    %299 = vector.load %arg8[%c0_122, %c0_123] : memref<16x256xf32, #tpu.memory_space<vmem>>, vector<16x256xf32>
    tpu.vector_store %arg8[%c0_122, %c0_123], %298 {strides = array<i32>} : memref<16x256xf32, #tpu.memory_space<vmem>>, vector<16x256xf32>,
    %cst_124 = arith.constant 0.000000e+00 : f32
    %300 = vector.broadcast %cst_124 : f32 to vector<2x64xf32>
    %cst_125 = arith.constant 0.000000e+00 : f32
    %301 = vector.broadcast %cst_125 : f32 to vector<2x64xf32>
    %302 = arith.truncf %300 : vector<2x64xf32> to vector<2x64xbf16>
    %cst_126 = arith.constant dense<0.000000e+00> : vector<2x256xf32>
    %303 = tpu.matmul %302, %292, %cst_126 {dimension_numbers = #tpu.dot_dimension_numbers<[1], [0], [0], [1], [0, 0, 1, 1], [], []>} : vector<2x64xbf16>, vector<64x256xbf16>, vector<2x256xf32> -> vector<2x256xf32>
    %c0_127 = arith.constant 0 : index
    %c0_128 = arith.constant 0 : index
    %304 = vector.load %arg8[%c0_127, %c0_128] : memref<16x256xf32, #tpu.memory_space<vmem>>, vector<2x256xf32>
    %305 = arith.addf %304, %303 : vector<2x256xf32>
    %306 = vector.extract_strided_slice %305 {offsets = [0, 0], sizes = [2, 64], strides = [1, 1]} : vector<2x256xf32> to vector<2x64xf32>
    %307 = arith.negf %306 : vector<2x64xf32>
    %308 = math.exp %307 : vector<2x64xf32>
    %cst_129 = arith.constant 1.000000e+00 : f32
    %309 = vector.broadcast %cst_129 : f32 to vector<2x64xf32>
    %310 = arith.addf %309, %308 : vector<2x64xf32>
    %311 = arith.divf %309, %310 : vector<2x64xf32>
    %312 = vector.extract_strided_slice %305 {offsets = [0, 64], sizes = [2, 64], strides = [1, 1]} : vector<2x256xf32> to vector<2x64xf32>
    %313 = arith.negf %312 : vector<2x64xf32>
    %314 = math.exp %313 : vector<2x64xf32>
    %cst_130 = arith.constant 1.000000e+00 : f32
    %315 = vector.broadcast %cst_130 : f32 to vector<2x64xf32>
    %316 = arith.addf %315, %314 : vector<2x64xf32>
    %317 = arith.divf %315, %316 : vector<2x64xf32>
    %318 = vector.extract_strided_slice %305 {offsets = [0, 128], sizes = [2, 64], strides = [1, 1]} : vector<2x256xf32> to vector<2x64xf32>
    %319 = math.tanh %318 : vector<2x64xf32>
    %320 = vector.extract_strided_slice %305 {offsets = [0, 192], sizes = [2, 64], strides = [1, 1]} : vector<2x256xf32> to vector<2x64xf32>
    %321 = arith.negf %320 : vector<2x64xf32>
    %322 = math.exp %321 : vector<2x64xf32>
    %cst_131 = arith.constant 1.000000e+00 : f32
    %323 = vector.broadcast %cst_131 : f32 to vector<2x64xf32>
    %324 = arith.addf %323, %322 : vector<2x64xf32>
    %325 = arith.divf %323, %324 : vector<2x64xf32>
    %326 = arith.mulf %317, %301 : vector<2x64xf32>
    %327 = arith.mulf %311, %319 : vector<2x64xf32>
    %328 = arith.addf %326, %327 : vector<2x64xf32>
    %329 = math.tanh %328 : vector<2x64xf32>
    %330 = arith.mulf %325, %329 : vector<2x64xf32>
    %331 = vector.extract_strided_slice %330 {offsets = [0, 0], sizes = [2, 32], strides = [1, 1]} : vector<2x64xf32> to vector<2x32xf32>
    %332 = vector.extract_strided_slice %330 {offsets = [0, 32], sizes = [2, 32], strides = [1, 1]} : vector<2x64xf32> to vector<2x32xf32>
    %c0_132 = arith.constant 0 : index
    %c0_133 = arith.constant 0 : index
    %c0_134 = arith.constant 0 : index
    %333 = vector.load %arg7[%c0_132, %c0_133, %c0_134] : memref<8x2x64xf32, #tpu.memory_space<vmem>>, vector<1x2x32xf32>
    %334 = vector.shape_cast %333 : vector<1x2x32xf32> to vector<2x32xf32>
    %335 = vector.shape_cast %331 : vector<2x32xf32> to vector<1x2x32xf32>
    tpu.vector_store %arg7[%c0_132, %c0_133, %c0_134], %335 {strides = array<i32>} : memref<8x2x64xf32, #tpu.memory_space<vmem>>, vector<1x2x32xf32>,
    %c7 = arith.constant 7 : index
    %c0_135 = arith.constant 0 : index
    %c32_136 = arith.constant 32 : index
    %336 = vector.load %arg7[%c7, %c0_135, %c32_136] : memref<8x2x64xf32, #tpu.memory_space<vmem>>, vector<1x2x32xf32>
    %337 = vector.shape_cast %336 : vector<1x2x32xf32> to vector<2x32xf32>
    %338 = vector.shape_cast %332 : vector<2x32xf32> to vector<1x2x32xf32>
    tpu.vector_store %arg7[%c7, %c0_135, %c32_136], %338 {strides = array<i32>} : memref<8x2x64xf32, #tpu.memory_space<vmem>>, vector<1x2x32xf32>,
    %339 = arith.truncf %330 : vector<2x64xf32> to vector<2x64xbf16>
    %cst_137 = arith.constant dense<0.000000e+00> : vector<2x256xf32>
    %340 = tpu.matmul %339, %292, %cst_137 {dimension_numbers = #tpu.dot_dimension_numbers<[1], [0], [0], [1], [0, 0, 1, 1], [], []>} : vector<2x64xbf16>, vector<64x256xbf16>, vector<2x256xf32> -> vector<2x256xf32>
    %c2_138 = arith.constant 2 : index
    %c0_139 = arith.constant 0 : index
    %341 = vector.load %arg8[%c2_138, %c0_139] : memref<16x256xf32, #tpu.memory_space<vmem>>, vector<2x256xf32>
    %342 = arith.addf %341, %340 : vector<2x256xf32>
    %343 = vector.extract_strided_slice %342 {offsets = [0, 0], sizes = [2, 64], strides = [1, 1]} : vector<2x256xf32> to vector<2x64xf32>
    %344 = arith.negf %343 : vector<2x64xf32>
    %345 = math.exp %344 : vector<2x64xf32>
    %cst_140 = arith.constant 1.000000e+00 : f32
    %346 = vector.broadcast %cst_140 : f32 to vector<2x64xf32>
    %347 = arith.addf %346, %345 : vector<2x64xf32>
    %348 = arith.divf %346, %347 : vector<2x64xf32>
    %349 = vector.extract_strided_slice %342 {offsets = [0, 64], sizes = [2, 64], strides = [1, 1]} : vector<2x256xf32> to vector<2x64xf32>
    %350 = arith.negf %349 : vector<2x64xf32>
    %351 = math.exp %350 : vector<2x64xf32>
    %cst_141 = arith.constant 1.000000e+00 : f32
    %352 = vector.broadcast %cst_141 : f32 to vector<2x64xf32>
    %353 = arith.addf %352, %351 : vector<2x64xf32>
    %354 = arith.divf %352, %353 : vector<2x64xf32>
    %355 = vector.extract_strided_slice %342 {offsets = [0, 128], sizes = [2, 64], strides = [1, 1]} : vector<2x256xf32> to vector<2x64xf32>
    %356 = math.tanh %355 : vector<2x64xf32>
    %357 = vector.extract_strided_slice %342 {offsets = [0, 192], sizes = [2, 64], strides = [1, 1]} : vector<2x256xf32> to vector<2x64xf32>
    %358 = arith.negf %357 : vector<2x64xf32>
    %359 = math.exp %358 : vector<2x64xf32>
    %cst_142 = arith.constant 1.000000e+00 : f32
    %360 = vector.broadcast %cst_142 : f32 to vector<2x64xf32>
    %361 = arith.addf %360, %359 : vector<2x64xf32>
    %362 = arith.divf %360, %361 : vector<2x64xf32>
    %363 = arith.mulf %354, %328 : vector<2x64xf32>
    %364 = arith.mulf %348, %356 : vector<2x64xf32>
    %365 = arith.addf %363, %364 : vector<2x64xf32>
    %366 = math.tanh %365 : vector<2x64xf32>
    %367 = arith.mulf %362, %366 : vector<2x64xf32>
    %368 = vector.extract_strided_slice %367 {offsets = [0, 0], sizes = [2, 32], strides = [1, 1]} : vector<2x64xf32> to vector<2x32xf32>
    %369 = vector.extract_strided_slice %367 {offsets = [0, 32], sizes = [2, 32], strides = [1, 1]} : vector<2x64xf32> to vector<2x32xf32>
    %c1 = arith.constant 1 : index
    %c0_143 = arith.constant 0 : index
    %c0_144 = arith.constant 0 : index
    %370 = vector.load %arg7[%c1, %c0_143, %c0_144] : memref<8x2x64xf32, #tpu.memory_space<vmem>>, vector<1x2x32xf32>
    %371 = vector.shape_cast %370 : vector<1x2x32xf32> to vector<2x32xf32>
    %372 = vector.shape_cast %368 : vector<2x32xf32> to vector<1x2x32xf32>
    tpu.vector_store %arg7[%c1, %c0_143, %c0_144], %372 {strides = array<i32>} : memref<8x2x64xf32, #tpu.memory_space<vmem>>, vector<1x2x32xf32>,
    %c6_145 = arith.constant 6 : index
    %c0_146 = arith.constant 0 : index
    %c32_147 = arith.constant 32 : index
    %373 = vector.load %arg7[%c6_145, %c0_146, %c32_147] : memref<8x2x64xf32, #tpu.memory_space<vmem>>, vector<1x2x32xf32>
    %374 = vector.shape_cast %373 : vector<1x2x32xf32> to vector<2x32xf32>
    %375 = vector.shape_cast %369 : vector<2x32xf32> to vector<1x2x32xf32>
    tpu.vector_store %arg7[%c6_145, %c0_146, %c32_147], %375 {strides = array<i32>} : memref<8x2x64xf32, #tpu.memory_space<vmem>>, vector<1x2x32xf32>,
    %376 = arith.truncf %367 : vector<2x64xf32> to vector<2x64xbf16>
    %cst_148 = arith.constant dense<0.000000e+00> : vector<2x256xf32>
    %377 = tpu.matmul %376, %292, %cst_148 {dimension_numbers = #tpu.dot_dimension_numbers<[1], [0], [0], [1], [0, 0, 1, 1], [], []>} : vector<2x64xbf16>, vector<64x256xbf16>, vector<2x256xf32> -> vector<2x256xf32>
    %c4_149 = arith.constant 4 : index
    %c0_150 = arith.constant 0 : index
    %378 = vector.load %arg8[%c4_149, %c0_150] : memref<16x256xf32, #tpu.memory_space<vmem>>, vector<2x256xf32>
    %379 = arith.addf %378, %377 : vector<2x256xf32>
    %380 = vector.extract_strided_slice %379 {offsets = [0, 0], sizes = [2, 64], strides = [1, 1]} : vector<2x256xf32> to vector<2x64xf32>
    %381 = arith.negf %380 : vector<2x64xf32>
    %382 = math.exp %381 : vector<2x64xf32>
    %cst_151 = arith.constant 1.000000e+00 : f32
    %383 = vector.broadcast %cst_151 : f32 to vector<2x64xf32>
    %384 = arith.addf %383, %382 : vector<2x64xf32>
    %385 = arith.divf %383, %384 : vector<2x64xf32>
    %386 = vector.extract_strided_slice %379 {offsets = [0, 64], sizes = [2, 64], strides = [1, 1]} : vector<2x256xf32> to vector<2x64xf32>
    %387 = arith.negf %386 : vector<2x64xf32>
    %388 = math.exp %387 : vector<2x64xf32>
    %cst_152 = arith.constant 1.000000e+00 : f32
    %389 = vector.broadcast %cst_152 : f32 to vector<2x64xf32>
    %390 = arith.addf %389, %388 : vector<2x64xf32>
    %391 = arith.divf %389, %390 : vector<2x64xf32>
    %392 = vector.extract_strided_slice %379 {offsets = [0, 128], sizes = [2, 64], strides = [1, 1]} : vector<2x256xf32> to vector<2x64xf32>
    %393 = math.tanh %392 : vector<2x64xf32>
    %394 = vector.extract_strided_slice %379 {offsets = [0, 192], sizes = [2, 64], strides = [1, 1]} : vector<2x256xf32> to vector<2x64xf32>
    %395 = arith.negf %394 : vector<2x64xf32>
    %396 = math.exp %395 : vector<2x64xf32>
    %cst_153 = arith.constant 1.000000e+00 : f32
    %397 = vector.broadcast %cst_153 : f32 to vector<2x64xf32>
    %398 = arith.addf %397, %396 : vector<2x64xf32>
    %399 = arith.divf %397, %398 : vector<2x64xf32>
    %400 = arith.mulf %391, %365 : vector<2x64xf32>
    %401 = arith.mulf %385, %393 : vector<2x64xf32>
    %402 = arith.addf %400, %401 : vector<2x64xf32>
    %403 = math.tanh %402 : vector<2x64xf32>
    %404 = arith.mulf %399, %403 : vector<2x64xf32>
    %405 = vector.extract_strided_slice %404 {offsets = [0, 0], sizes = [2, 32], strides = [1, 1]} : vector<2x64xf32> to vector<2x32xf32>
    %406 = vector.extract_strided_slice %404 {offsets = [0, 32], sizes = [2, 32], strides = [1, 1]} : vector<2x64xf32> to vector<2x32xf32>
    %c2_154 = arith.constant 2 : index
    %c0_155 = arith.constant 0 : index
    %c0_156 = arith.constant 0 : index
    %407 = vector.load %arg7[%c2_154, %c0_155, %c0_156] : memref<8x2x64xf32, #tpu.memory_space<vmem>>, vector<1x2x32xf32>
    %408 = vector.shape_cast %407 : vector<1x2x32xf32> to vector<2x32xf32>
    %409 = vector.shape_cast %405 : vector<2x32xf32> to vector<1x2x32xf32>
    tpu.vector_store %arg7[%c2_154, %c0_155, %c0_156], %409 {strides = array<i32>} : memref<8x2x64xf32, #tpu.memory_space<vmem>>, vector<1x2x32xf32>,
    %c5 = arith.constant 5 : index
    %c0_157 = arith.constant 0 : index
    %c32_158 = arith.constant 32 : index
    %410 = vector.load %arg7[%c5, %c0_157, %c32_158] : memref<8x2x64xf32, #tpu.memory_space<vmem>>, vector<1x2x32xf32>
    %411 = vector.shape_cast %410 : vector<1x2x32xf32> to vector<2x32xf32>
    %412 = vector.shape_cast %406 : vector<2x32xf32> to vector<1x2x32xf32>
    tpu.vector_store %arg7[%c5, %c0_157, %c32_158], %412 {strides = array<i32>} : memref<8x2x64xf32, #tpu.memory_space<vmem>>, vector<1x2x32xf32>,
    %413 = arith.truncf %404 : vector<2x64xf32> to vector<2x64xbf16>
    %cst_159 = arith.constant dense<0.000000e+00> : vector<2x256xf32>
    %414 = tpu.matmul %413, %292, %cst_159 {dimension_numbers = #tpu.dot_dimension_numbers<[1], [0], [0], [1], [0, 0, 1, 1], [], []>} : vector<2x64xbf16>, vector<64x256xbf16>, vector<2x256xf32> -> vector<2x256xf32>
    %c6_160 = arith.constant 6 : index
    %c0_161 = arith.constant 0 : index
    %415 = vector.load %arg8[%c6_160, %c0_161] : memref<16x256xf32, #tpu.memory_space<vmem>>, vector<2x256xf32>
    %416 = arith.addf %415, %414 : vector<2x256xf32>
    %417 = vector.extract_strided_slice %416 {offsets = [0, 0], sizes = [2, 64], strides = [1, 1]} : vector<2x256xf32> to vector<2x64xf32>
    %418 = arith.negf %417 : vector<2x64xf32>
    %419 = math.exp %418 : vector<2x64xf32>
    %cst_162 = arith.constant 1.000000e+00 : f32
    %420 = vector.broadcast %cst_162 : f32 to vector<2x64xf32>
    %421 = arith.addf %420, %419 : vector<2x64xf32>
    %422 = arith.divf %420, %421 : vector<2x64xf32>
    %423 = vector.extract_strided_slice %416 {offsets = [0, 64], sizes = [2, 64], strides = [1, 1]} : vector<2x256xf32> to vector<2x64xf32>
    %424 = arith.negf %423 : vector<2x64xf32>
    %425 = math.exp %424 : vector<2x64xf32>
    %cst_163 = arith.constant 1.000000e+00 : f32
    %426 = vector.broadcast %cst_163 : f32 to vector<2x64xf32>
    %427 = arith.addf %426, %425 : vector<2x64xf32>
    %428 = arith.divf %426, %427 : vector<2x64xf32>
    %429 = vector.extract_strided_slice %416 {offsets = [0, 128], sizes = [2, 64], strides = [1, 1]} : vector<2x256xf32> to vector<2x64xf32>
    %430 = math.tanh %429 : vector<2x64xf32>
    %431 = vector.extract_strided_slice %416 {offsets = [0, 192], sizes = [2, 64], strides = [1, 1]} : vector<2x256xf32> to vector<2x64xf32>
    %432 = arith.negf %431 : vector<2x64xf32>
    %433 = math.exp %432 : vector<2x64xf32>
    %cst_164 = arith.constant 1.000000e+00 : f32
    %434 = vector.broadcast %cst_164 : f32 to vector<2x64xf32>
    %435 = arith.addf %434, %433 : vector<2x64xf32>
    %436 = arith.divf %434, %435 : vector<2x64xf32>
    %437 = arith.mulf %428, %402 : vector<2x64xf32>
    %438 = arith.mulf %422, %430 : vector<2x64xf32>
    %439 = arith.addf %437, %438 : vector<2x64xf32>
    %440 = math.tanh %439 : vector<2x64xf32>
    %441 = arith.mulf %436, %440 : vector<2x64xf32>
    %442 = vector.extract_strided_slice %441 {offsets = [0, 0], sizes = [2, 32], strides = [1, 1]} : vector<2x64xf32> to vector<2x32xf32>
    %443 = vector.extract_strided_slice %441 {offsets = [0, 32], sizes = [2, 32], strides = [1, 1]} : vector<2x64xf32> to vector<2x32xf32>
    %c3 = arith.constant 3 : index
    %c0_165 = arith.constant 0 : index
    %c0_166 = arith.constant 0 : index
    %444 = vector.load %arg7[%c3, %c0_165, %c0_166] : memref<8x2x64xf32, #tpu.memory_space<vmem>>, vector<1x2x32xf32>
    %445 = vector.shape_cast %444 : vector<1x2x32xf32> to vector<2x32xf32>
    %446 = vector.shape_cast %442 : vector<2x32xf32> to vector<1x2x32xf32>
    tpu.vector_store %arg7[%c3, %c0_165, %c0_166], %446 {strides = array<i32>} : memref<8x2x64xf32, #tpu.memory_space<vmem>>, vector<1x2x32xf32>,
    %c4_167 = arith.constant 4 : index
    %c0_168 = arith.constant 0 : index
    %c32_169 = arith.constant 32 : index
    %447 = vector.load %arg7[%c4_167, %c0_168, %c32_169] : memref<8x2x64xf32, #tpu.memory_space<vmem>>, vector<1x2x32xf32>
    %448 = vector.shape_cast %447 : vector<1x2x32xf32> to vector<2x32xf32>
    %449 = vector.shape_cast %443 : vector<2x32xf32> to vector<1x2x32xf32>
    tpu.vector_store %arg7[%c4_167, %c0_168, %c32_169], %449 {strides = array<i32>} : memref<8x2x64xf32, #tpu.memory_space<vmem>>, vector<1x2x32xf32>,
    %450 = arith.truncf %441 : vector<2x64xf32> to vector<2x64xbf16>
    %cst_170 = arith.constant dense<0.000000e+00> : vector<2x256xf32>
    %451 = tpu.matmul %450, %292, %cst_170 {dimension_numbers = #tpu.dot_dimension_numbers<[1], [0], [0], [1], [0, 0, 1, 1], [], []>} : vector<2x64xbf16>, vector<64x256xbf16>, vector<2x256xf32> -> vector<2x256xf32>
    %c8_171 = arith.constant 8 : index
    %c0_172 = arith.constant 0 : index
    %452 = vector.load %arg8[%c8_171, %c0_172] : memref<16x256xf32, #tpu.memory_space<vmem>>, vector<2x256xf32>
    %453 = arith.addf %452, %451 : vector<2x256xf32>
    %454 = vector.extract_strided_slice %453 {offsets = [0, 0], sizes = [2, 64], strides = [1, 1]} : vector<2x256xf32> to vector<2x64xf32>
    %455 = arith.negf %454 : vector<2x64xf32>
    %456 = math.exp %455 : vector<2x64xf32>
    %cst_173 = arith.constant 1.000000e+00 : f32
    %457 = vector.broadcast %cst_173 : f32 to vector<2x64xf32>
    %458 = arith.addf %457, %456 : vector<2x64xf32>
    %459 = arith.divf %457, %458 : vector<2x64xf32>
    %460 = vector.extract_strided_slice %453 {offsets = [0, 64], sizes = [2, 64], strides = [1, 1]} : vector<2x256xf32> to vector<2x64xf32>
    %461 = arith.negf %460 : vector<2x64xf32>
    %462 = math.exp %461 : vector<2x64xf32>
    %cst_174 = arith.constant 1.000000e+00 : f32
    %463 = vector.broadcast %cst_174 : f32 to vector<2x64xf32>
    %464 = arith.addf %463, %462 : vector<2x64xf32>
    %465 = arith.divf %463, %464 : vector<2x64xf32>
    %466 = vector.extract_strided_slice %453 {offsets = [0, 128], sizes = [2, 64], strides = [1, 1]} : vector<2x256xf32> to vector<2x64xf32>
    %467 = math.tanh %466 : vector<2x64xf32>
    %468 = vector.extract_strided_slice %453 {offsets = [0, 192], sizes = [2, 64], strides = [1, 1]} : vector<2x256xf32> to vector<2x64xf32>
    %469 = arith.negf %468 : vector<2x64xf32>
    %470 = math.exp %469 : vector<2x64xf32>
    %cst_175 = arith.constant 1.000000e+00 : f32
    %471 = vector.broadcast %cst_175 : f32 to vector<2x64xf32>
    %472 = arith.addf %471, %470 : vector<2x64xf32>
    %473 = arith.divf %471, %472 : vector<2x64xf32>
    %474 = arith.mulf %465, %439 : vector<2x64xf32>
    %475 = arith.mulf %459, %467 : vector<2x64xf32>
    %476 = arith.addf %474, %475 : vector<2x64xf32>
    %477 = math.tanh %476 : vector<2x64xf32>
    %478 = arith.mulf %473, %477 : vector<2x64xf32>
    %479 = vector.extract_strided_slice %478 {offsets = [0, 0], sizes = [2, 32], strides = [1, 1]} : vector<2x64xf32> to vector<2x32xf32>
    %480 = vector.extract_strided_slice %478 {offsets = [0, 32], sizes = [2, 32], strides = [1, 1]} : vector<2x64xf32> to vector<2x32xf32>
    %c4_176 = arith.constant 4 : index
    %c0_177 = arith.constant 0 : index
    %c0_178 = arith.constant 0 : index
    %481 = vector.load %arg7[%c4_176, %c0_177, %c0_178] : memref<8x2x64xf32, #tpu.memory_space<vmem>>, vector<1x2x32xf32>
    %482 = vector.shape_cast %481 : vector<1x2x32xf32> to vector<2x32xf32>
    %483 = vector.shape_cast %479 : vector<2x32xf32> to vector<1x2x32xf32>
    tpu.vector_store %arg7[%c4_176, %c0_177, %c0_178], %483 {strides = array<i32>} : memref<8x2x64xf32, #tpu.memory_space<vmem>>, vector<1x2x32xf32>,
    %c3_179 = arith.constant 3 : index
    %c0_180 = arith.constant 0 : index
    %c32_181 = arith.constant 32 : index
    %484 = vector.load %arg7[%c3_179, %c0_180, %c32_181] : memref<8x2x64xf32, #tpu.memory_space<vmem>>, vector<1x2x32xf32>
    %485 = vector.shape_cast %484 : vector<1x2x32xf32> to vector<2x32xf32>
    %486 = vector.shape_cast %480 : vector<2x32xf32> to vector<1x2x32xf32>
    tpu.vector_store %arg7[%c3_179, %c0_180, %c32_181], %486 {strides = array<i32>} : memref<8x2x64xf32, #tpu.memory_space<vmem>>, vector<1x2x32xf32>,
    %487 = arith.truncf %478 : vector<2x64xf32> to vector<2x64xbf16>
    %cst_182 = arith.constant dense<0.000000e+00> : vector<2x256xf32>
    %488 = tpu.matmul %487, %292, %cst_182 {dimension_numbers = #tpu.dot_dimension_numbers<[1], [0], [0], [1], [0, 0, 1, 1], [], []>} : vector<2x64xbf16>, vector<64x256xbf16>, vector<2x256xf32> -> vector<2x256xf32>
    %c10_183 = arith.constant 10 : index
    %c0_184 = arith.constant 0 : index
    %489 = vector.load %arg8[%c10_183, %c0_184] : memref<16x256xf32, #tpu.memory_space<vmem>>, vector<2x256xf32>
    %490 = arith.addf %489, %488 : vector<2x256xf32>
    %491 = vector.extract_strided_slice %490 {offsets = [0, 0], sizes = [2, 64], strides = [1, 1]} : vector<2x256xf32> to vector<2x64xf32>
    %492 = arith.negf %491 : vector<2x64xf32>
    %493 = math.exp %492 : vector<2x64xf32>
    %cst_185 = arith.constant 1.000000e+00 : f32
    %494 = vector.broadcast %cst_185 : f32 to vector<2x64xf32>
    %495 = arith.addf %494, %493 : vector<2x64xf32>
    %496 = arith.divf %494, %495 : vector<2x64xf32>
    %497 = vector.extract_strided_slice %490 {offsets = [0, 64], sizes = [2, 64], strides = [1, 1]} : vector<2x256xf32> to vector<2x64xf32>
    %498 = arith.negf %497 : vector<2x64xf32>
    %499 = math.exp %498 : vector<2x64xf32>
    %cst_186 = arith.constant 1.000000e+00 : f32
    %500 = vector.broadcast %cst_186 : f32 to vector<2x64xf32>
    %501 = arith.addf %500, %499 : vector<2x64xf32>
    %502 = arith.divf %500, %501 : vector<2x64xf32>
    %503 = vector.extract_strided_slice %490 {offsets = [0, 128], sizes = [2, 64], strides = [1, 1]} : vector<2x256xf32> to vector<2x64xf32>
    %504 = math.tanh %503 : vector<2x64xf32>
    %505 = vector.extract_strided_slice %490 {offsets = [0, 192], sizes = [2, 64], strides = [1, 1]} : vector<2x256xf32> to vector<2x64xf32>
    %506 = arith.negf %505 : vector<2x64xf32>
    %507 = math.exp %506 : vector<2x64xf32>
    %cst_187 = arith.constant 1.000000e+00 : f32
    %508 = vector.broadcast %cst_187 : f32 to vector<2x64xf32>
    %509 = arith.addf %508, %507 : vector<2x64xf32>
    %510 = arith.divf %508, %509 : vector<2x64xf32>
    %511 = arith.mulf %502, %476 : vector<2x64xf32>
    %512 = arith.mulf %496, %504 : vector<2x64xf32>
    %513 = arith.addf %511, %512 : vector<2x64xf32>
    %514 = math.tanh %513 : vector<2x64xf32>
    %515 = arith.mulf %510, %514 : vector<2x64xf32>
    %516 = vector.extract_strided_slice %515 {offsets = [0, 0], sizes = [2, 32], strides = [1, 1]} : vector<2x64xf32> to vector<2x32xf32>
    %517 = vector.extract_strided_slice %515 {offsets = [0, 32], sizes = [2, 32], strides = [1, 1]} : vector<2x64xf32> to vector<2x32xf32>
    %c5_188 = arith.constant 5 : index
    %c0_189 = arith.constant 0 : index
    %c0_190 = arith.constant 0 : index
    %518 = vector.load %arg7[%c5_188, %c0_189, %c0_190] : memref<8x2x64xf32, #tpu.memory_space<vmem>>, vector<1x2x32xf32>
    %519 = vector.shape_cast %518 : vector<1x2x32xf32> to vector<2x32xf32>
    %520 = vector.shape_cast %516 : vector<2x32xf32> to vector<1x2x32xf32>
    tpu.vector_store %arg7[%c5_188, %c0_189, %c0_190], %520 {strides = array<i32>} : memref<8x2x64xf32, #tpu.memory_space<vmem>>, vector<1x2x32xf32>,
    %c2_191 = arith.constant 2 : index
    %c0_192 = arith.constant 0 : index
    %c32_193 = arith.constant 32 : index
    %521 = vector.load %arg7[%c2_191, %c0_192, %c32_193] : memref<8x2x64xf32, #tpu.memory_space<vmem>>, vector<1x2x32xf32>
    %522 = vector.shape_cast %521 : vector<1x2x32xf32> to vector<2x32xf32>
    %523 = vector.shape_cast %517 : vector<2x32xf32> to vector<1x2x32xf32>
    tpu.vector_store %arg7[%c2_191, %c0_192, %c32_193], %523 {strides = array<i32>} : memref<8x2x64xf32, #tpu.memory_space<vmem>>, vector<1x2x32xf32>,
    %524 = arith.truncf %515 : vector<2x64xf32> to vector<2x64xbf16>
    %cst_194 = arith.constant dense<0.000000e+00> : vector<2x256xf32>
    %525 = tpu.matmul %524, %292, %cst_194 {dimension_numbers = #tpu.dot_dimension_numbers<[1], [0], [0], [1], [0, 0, 1, 1], [], []>} : vector<2x64xbf16>, vector<64x256xbf16>, vector<2x256xf32> -> vector<2x256xf32>
    %c12_195 = arith.constant 12 : index
    %c0_196 = arith.constant 0 : index
    %526 = vector.load %arg8[%c12_195, %c0_196] : memref<16x256xf32, #tpu.memory_space<vmem>>, vector<2x256xf32>
    %527 = arith.addf %526, %525 : vector<2x256xf32>
    %528 = vector.extract_strided_slice %527 {offsets = [0, 0], sizes = [2, 64], strides = [1, 1]} : vector<2x256xf32> to vector<2x64xf32>
    %529 = arith.negf %528 : vector<2x64xf32>
    %530 = math.exp %529 : vector<2x64xf32>
    %cst_197 = arith.constant 1.000000e+00 : f32
    %531 = vector.broadcast %cst_197 : f32 to vector<2x64xf32>
    %532 = arith.addf %531, %530 : vector<2x64xf32>
    %533 = arith.divf %531, %532 : vector<2x64xf32>
    %534 = vector.extract_strided_slice %527 {offsets = [0, 64], sizes = [2, 64], strides = [1, 1]} : vector<2x256xf32> to vector<2x64xf32>
    %535 = arith.negf %534 : vector<2x64xf32>
    %536 = math.exp %535 : vector<2x64xf32>
    %cst_198 = arith.constant 1.000000e+00 : f32
    %537 = vector.broadcast %cst_198 : f32 to vector<2x64xf32>
    %538 = arith.addf %537, %536 : vector<2x64xf32>
    %539 = arith.divf %537, %538 : vector<2x64xf32>
    %540 = vector.extract_strided_slice %527 {offsets = [0, 128], sizes = [2, 64], strides = [1, 1]} : vector<2x256xf32> to vector<2x64xf32>
    %541 = math.tanh %540 : vector<2x64xf32>
    %542 = vector.extract_strided_slice %527 {offsets = [0, 192], sizes = [2, 64], strides = [1, 1]} : vector<2x256xf32> to vector<2x64xf32>
    %543 = arith.negf %542 : vector<2x64xf32>
    %544 = math.exp %543 : vector<2x64xf32>
    %cst_199 = arith.constant 1.000000e+00 : f32
    %545 = vector.broadcast %cst_199 : f32 to vector<2x64xf32>
    %546 = arith.addf %545, %544 : vector<2x64xf32>
    %547 = arith.divf %545, %546 : vector<2x64xf32>
    %548 = arith.mulf %539, %513 : vector<2x64xf32>
    %549 = arith.mulf %533, %541 : vector<2x64xf32>
    %550 = arith.addf %548, %549 : vector<2x64xf32>
    %551 = math.tanh %550 : vector<2x64xf32>
    %552 = arith.mulf %547, %551 : vector<2x64xf32>
    %553 = vector.extract_strided_slice %552 {offsets = [0, 0], sizes = [2, 32], strides = [1, 1]} : vector<2x64xf32> to vector<2x32xf32>
    %554 = vector.extract_strided_slice %552 {offsets = [0, 32], sizes = [2, 32], strides = [1, 1]} : vector<2x64xf32> to vector<2x32xf32>
    %c6_200 = arith.constant 6 : index
    %c0_201 = arith.constant 0 : index
    %c0_202 = arith.constant 0 : index
    %555 = vector.load %arg7[%c6_200, %c0_201, %c0_202] : memref<8x2x64xf32, #tpu.memory_space<vmem>>, vector<1x2x32xf32>
    %556 = vector.shape_cast %555 : vector<1x2x32xf32> to vector<2x32xf32>
    %557 = vector.shape_cast %553 : vector<2x32xf32> to vector<1x2x32xf32>
    tpu.vector_store %arg7[%c6_200, %c0_201, %c0_202], %557 {strides = array<i32>} : memref<8x2x64xf32, #tpu.memory_space<vmem>>, vector<1x2x32xf32>,
    %c1_203 = arith.constant 1 : index
    %c0_204 = arith.constant 0 : index
    %c32_205 = arith.constant 32 : index
    %558 = vector.load %arg7[%c1_203, %c0_204, %c32_205] : memref<8x2x64xf32, #tpu.memory_space<vmem>>, vector<1x2x32xf32>
    %559 = vector.shape_cast %558 : vector<1x2x32xf32> to vector<2x32xf32>
    %560 = vector.shape_cast %554 : vector<2x32xf32> to vector<1x2x32xf32>
    tpu.vector_store %arg7[%c1_203, %c0_204, %c32_205], %560 {strides = array<i32>} : memref<8x2x64xf32, #tpu.memory_space<vmem>>, vector<1x2x32xf32>,
    %561 = arith.truncf %552 : vector<2x64xf32> to vector<2x64xbf16>
    %cst_206 = arith.constant dense<0.000000e+00> : vector<2x256xf32>
    %562 = tpu.matmul %561, %292, %cst_206 {dimension_numbers = #tpu.dot_dimension_numbers<[1], [0], [0], [1], [0, 0, 1, 1], [], []>} : vector<2x64xbf16>, vector<64x256xbf16>, vector<2x256xf32> -> vector<2x256xf32>
    %c14_207 = arith.constant 14 : index
    %c0_208 = arith.constant 0 : index
    %563 = vector.load %arg8[%c14_207, %c0_208] : memref<16x256xf32, #tpu.memory_space<vmem>>, vector<2x256xf32>
    %564 = arith.addf %563, %562 : vector<2x256xf32>
    %565 = vector.extract_strided_slice %564 {offsets = [0, 0], sizes = [2, 64], strides = [1, 1]} : vector<2x256xf32> to vector<2x64xf32>
    %566 = arith.negf %565 : vector<2x64xf32>
    %567 = math.exp %566 : vector<2x64xf32>
    %cst_209 = arith.constant 1.000000e+00 : f32
    %568 = vector.broadcast %cst_209 : f32 to vector<2x64xf32>
    %569 = arith.addf %568, %567 : vector<2x64xf32>
    %570 = arith.divf %568, %569 : vector<2x64xf32>
    %571 = vector.extract_strided_slice %564 {offsets = [0, 64], sizes = [2, 64], strides = [1, 1]} : vector<2x256xf32> to vector<2x64xf32>
    %572 = arith.negf %571 : vector<2x64xf32>
    %573 = math.exp %572 : vector<2x64xf32>
    %cst_210 = arith.constant 1.000000e+00 : f32
    %574 = vector.broadcast %cst_210 : f32 to vector<2x64xf32>
    %575 = arith.addf %574, %573 : vector<2x64xf32>
    %576 = arith.divf %574, %575 : vector<2x64xf32>
    %577 = vector.extract_strided_slice %564 {offsets = [0, 128], sizes = [2, 64], strides = [1, 1]} : vector<2x256xf32> to vector<2x64xf32>
    %578 = math.tanh %577 : vector<2x64xf32>
    %579 = vector.extract_strided_slice %564 {offsets = [0, 192], sizes = [2, 64], strides = [1, 1]} : vector<2x256xf32> to vector<2x64xf32>
    %580 = arith.negf %579 : vector<2x64xf32>
    %581 = math.exp %580 : vector<2x64xf32>
    %cst_211 = arith.constant 1.000000e+00 : f32
    %582 = vector.broadcast %cst_211 : f32 to vector<2x64xf32>
    %583 = arith.addf %582, %581 : vector<2x64xf32>
    %584 = arith.divf %582, %583 : vector<2x64xf32>
    %585 = arith.mulf %576, %550 : vector<2x64xf32>
    %586 = arith.mulf %570, %578 : vector<2x64xf32>
    %587 = arith.addf %585, %586 : vector<2x64xf32>
    %588 = math.tanh %587 : vector<2x64xf32>
    %589 = arith.mulf %584, %588 : vector<2x64xf32>
    %590 = vector.extract_strided_slice %589 {offsets = [0, 0], sizes = [2, 32], strides = [1, 1]} : vector<2x64xf32> to vector<2x32xf32>
    %591 = vector.extract_strided_slice %589 {offsets = [0, 32], sizes = [2, 32], strides = [1, 1]} : vector<2x64xf32> to vector<2x32xf32>
    %c7_212 = arith.constant 7 : index
    %c0_213 = arith.constant 0 : index
    %c0_214 = arith.constant 0 : index
    %592 = vector.load %arg7[%c7_212, %c0_213, %c0_214] : memref<8x2x64xf32, #tpu.memory_space<vmem>>, vector<1x2x32xf32>
    %593 = vector.shape_cast %592 : vector<1x2x32xf32> to vector<2x32xf32>
    %594 = vector.shape_cast %590 : vector<2x32xf32> to vector<1x2x32xf32>
    tpu.vector_store %arg7[%c7_212, %c0_213, %c0_214], %594 {strides = array<i32>} : memref<8x2x64xf32, #tpu.memory_space<vmem>>, vector<1x2x32xf32>,
    %c0_215 = arith.constant 0 : index
    %c0_216 = arith.constant 0 : index
    %c32_217 = arith.constant 32 : index
    %595 = vector.load %arg7[%c0_215, %c0_216, %c32_217] : memref<8x2x64xf32, #tpu.memory_space<vmem>>, vector<1x2x32xf32>
    %596 = vector.shape_cast %595 : vector<1x2x32xf32> to vector<2x32xf32>
    %597 = vector.shape_cast %591 : vector<2x32xf32> to vector<1x2x32xf32>
    tpu.vector_store %arg7[%c0_215, %c0_216, %c32_217], %597 {strides = array<i32>} : memref<8x2x64xf32, #tpu.memory_space<vmem>>, vector<1x2x32xf32>,
    return
  }
}

</mosaic_0001>

<bundles_post_ra>
// kernel: bidirectional_lstm.1
= control target key start
LH: loop header
LB: loop body
LE: loop exit
PB: predicated region body
PF: predicated region fallthrough
CT: control target
= control target key end

     0   :  { %v2153_v1 = vmov 0   ;;  %vm74_vm0 = vcmask 261120   ;;  %v44_v16 = vlaneseq  ;;  %vm242_vm1 = vcmask 779776   ;;  %s2742_s1 = inlined_call_operand.vmem [shape: bf16[32,256], index: 1, kind: input, shape index: {}]   ;;  %s2743_s2 = inlined_call_operand.vmem [shape: bf16[64,256], index: 2, kind: input, shape index: {}]   ;;  %s2744_s0 = inlined_call_operand.vmem [shape: f32[16,32], index: 0, kind: input, shape index: {}]   ;;  %s2745_s3 = inlined_call_operand.vmem [shape: f32[1,256], index: 3, kind: input, shape index: {}]   ;;  %s2746_s4 = inlined_call_operand.vmem [shape: bf16[128,256], index: 4, kind: input, shape index: {}]   ;;  %s2747_s5 = inlined_call_operand.vmem [shape: bf16[64,256], index: 5, kind: input, shape index: {}]   ;;  %s2748_s6 = inlined_call_operand.vmem [shape: f32[1,256], index: 6, kind: input, shape index: {}]   ;;  %s2749_s7 = inlined_call_operand.vmem [shape: f32[8,2,64], index: 7, kind: output, shape index: {}]  }
   0x1   :  { %v1907_v0 = vld [vmem:[%s2742_s1 + $0x4] ss:$8 sps:$4 sm:$0xff]   ;;  %110 = vmatprep.mubr.bf16.mxu0 %v2153_v1  ;;  %201 = vmatprep.mubr.bf16.mxu1 %v2153_v1  ;;  %v1911_v3 = vld [vmem:[%s2742_s1] ss:$8 sps:$4 sm:$0xff]   ;;  %v1913_v5 = vld [vmem:[%s2742_s1 + $0x14] ss:$8 sps:$4 sm:$0xff]  }
   0x2   :  { %v2203_v2 = vld [vmem:[%s2743_s2 + $0x4] ss:$8 sps:$4 sm:$0xff]   ;;  %78 = vmatprep.subr.bf16.mxu0 %v1907_v0  ;;  %v2211_v4 = vld [vmem:[%s2743_s2] ss:$8 sps:$4 sm:$0xff]   ;;  %v2221_v6 = vld [vmem:[%s2743_s2 + $0x14] ss:$8 sps:$4 sm:$0xff]  }
   0x3   :  { %169 = vmatprep.subr.bf16.mxu1 %v2203_v2  ;;  %79 = vmatpush1.bf16.msra.mxu0 %v1911_v3  ;;  %v1917_v7 = vld [vmem:[%s2742_s1 + $0x10] ss:$8 sps:$4 sm:$0xff]   ;;  %v40_v9 = vld [vmem:[%s2744_s0] sm:$0xff]  ;;  %v41_v10 = vld [vmem:[%s2744_s0 + $0x8] sm:$0xff]  ;;  %v2284_v17 = vshrl.u32 %v44_v16, 7  ;;  %vm165_vm2 = vcmask 523264  }
   0x4   :  { %170 = vmatpush1.bf16.msra.mxu1 %v2211_v4  ;;  %80 = vmatprep.subr.bf16.mxu0 %v1913_v5  ;;  %v2229_v8 = vld [vmem:[%s2743_s2 + $0x10] ss:$8 sps:$4 sm:$0xff]   ;;  %v2241_v11 = vld [vmem:[%s2743_s2 + $0x24] ss:$8 sps:$4 sm:$0xff]   ;;  %v42_v12 = vpack.c.bf16 %v41_v10, %v40_v9  ;;  %v2247_v13 = vld [vmem:[%s2743_s2 + $0x20] ss:$8 sps:$4 sm:$0xff]  }
   0x5   :  { %171 = vmatprep.subr.bf16.mxu1 %v2221_v6  ;;  %v2253_v14 = vld [vmem:[%s2743_s2 + $0x34] ss:$8 sps:$4 sm:$0xff]   ;;  %v2260_v15 = vld [vmem:[%s2743_s2 + $0x30] ss:$8 sps:$4 sm:$0xff]   ;;  %v46_v18 = vsub.s32 0, %v2284_v17  ;;  %v50_v20 = vsub.s32 1, %v2284_v17 }
   0x6   :  { %v39_v19 = vld [vmem:[%s2745_s3] sm:$0x3]  ;;  %s2154_s3 = smov 64   ;;  %vm337_vm3 = vcmask 781826   ;;  %vm433_vm4 = vcmask 783876   ;;  %vm529_vm5 = vcmask 785926  }
   0x7   :  { %81 = vmatpush1.bf16.msra.mxu0 %v1917_v7  ;;  %v47_v21 = vrot.slane %v39_v19, %v46_v18  ;;  %v51_v22 = vrot.slane %v39_v19, %v50_v20  ;;  %vm240_vm6 = vcmask 254976   ;;  %vm244_vm7 = vcmask 517376  }
   0x8   :  { %172 = vmatpush1.bf16.msra.mxu1 %v2229_v8  ;;  %255 = vmatprep.subr.bf16.mxu0 %v2203_v2  ;;  %vm246_vm8 = vcmask 1042176   ;;  %vm431_vm9 = vcmask 259076   ;;  %vm435_vm10 = vcmask 521476   ;;  %vm437_vm11 = vcmask 1046276  }
   0x9   :  { %173 = vmatprep.subr.bf16.mxu1 %v2241_v11  ;;  %vm335_vm12 = vcmask 257026   ;;  %vm339_vm13 = vcmask 519426   ;;  %vm341_vm14 = vcmask 1044226   ;;  %vm527_vm15 = vcmask 261126  }
   0xa   :  { %1812 = vmatmul.mubr.msk.bf16.vlgmr.msra.gmra.mrb[0].mxu0 %vm74_vm0, %v42_v12  ;;  %vm531_vm0 = vcmask 523526  }
   0xb   :  { %256 = vmatpush1.bf16.msra.mxu0 %v2211_v4  ;;  %287 = vmatprep.mubr.bf16.mxu0 %v2153_v1 }
   0xc   :  { %174 = vmatpush1.bf16.msra.mxu1 %v2247_v13  ;;  %257 = vmatprep.subr.bf16.mxu0 %v2221_v6 }
   0xd   :  { %175 = vmatprep.subr.bf16.mxu1 %v2253_v14 }
   0xf   :  { %258 = vmatpush1.bf16.msra.mxu0 %v2229_v8 }
  0x10   :  { %176 = vmatpush1.bf16.msra.mxu1 %v2260_v15  ;;  %259 = vmatprep.subr.bf16.mxu0 %v2241_v11 }
  0x11   :  { %351 = vmatprep.subr.bf16.mxu1 %v2203_v2 }
  0x13   :  { %202 = vmatmul.mubr.bf16.vlgmr.msra.gmra.mrb[0].mxu1 %v2153_v1  ;;  %260 = vmatpush1.bf16.msra.mxu0 %v2247_v13 }
  0x14   :  { %352 = vmatpush1.bf16.msra.mxu1 %v2211_v4  ;;  %261 = vmatprep.subr.bf16.mxu0 %v2253_v14 }
  0x15   :  { %353 = vmatprep.subr.bf16.mxu1 %v2221_v6  ;;  %383 = vmatprep.mubr.bf16.mxu1 %v2153_v1 }
  0x17   :  { %262 = vmatpush1.bf16.msra.mxu0 %v2260_v15 }
  0x18   :  { %354 = vmatpush1.bf16.msra.mxu1 %v2229_v8  ;;  %447 = vmatprep.subr.bf16.mxu0 %v2203_v2 }
  0x19   :  { %355 = vmatprep.subr.bf16.mxu1 %v2241_v11 }
  0x1c   :  { %356 = vmatpush1.bf16.msra.mxu1 %v2247_v13 }
  0x1d   :  { %357 = vmatprep.subr.bf16.mxu1 %v2253_v14 }
  0x20   :  { %358 = vmatpush1.bf16.msra.mxu1 %v2260_v15 }
  0x21   :  { %543 = vmatprep.subr.bf16.mxu1 %v2203_v2 }
  0xdd   :  { %v112_v23 = vpop.f32.mrb[0].mxu0 }
  0xde   :  { %v113_v24 = vadd.f32 %v112_v23, %v47_v21  ;;  %v114_v25 = vpop.f32.mrb[1].mxu0 }
  0xdf   :  { %v115_v26 = vadd.f32 %v114_v25, %v51_v22  ;;  %v116_v27 = vpop.f32.mrb[2].mxu0 }
  0xe0   :  { %121 = vst [vmem:[#allocation2] sm:$0xff] %v113_v24  ;;  %v117_v28 = vadd.f32 %v116_v27, %v47_v21  ;;  %v118_v29 = vpop.f32.mrb[3].mxu0 }
  0xe1   :  { %122 = vst [vmem:[#allocation2 + $0x8] sm:$0xff] %v115_v26  ;;  %v119_v30 = vadd.f32 %v118_v29, %v51_v22 }
  0xe2   :  { %123 = vst [vmem:[#allocation2 + $0x10] sm:$0xff] %v117_v28 }
  0xe3   :  { %124 = vst [vmem:[#allocation2 + $0x18] sm:$0xff] %v119_v30 }
  0xe6   :  { %v203_v31 = vpop.f32.mrb[0].mxu1 }
  0xe7   :  { %v205_v32 = vpop.f32.mrb[1].mxu1  ;;  %v210_v33 = vld [vmem:[#allocation2] sm:$0x3]  ;;  %v296_v59 = vld [vmem:[#allocation2] sm:$0xc] }
  0xe8   :  { %v207_v34 = vpop.f32.mrb[2].mxu1  ;;  %v212_v35 = vadd.f32 %v210_v33, %v203_v31  ;;  %v211_v38 = vld [vmem:[#allocation2 + $0x8] sm:$0x3]  ;;  %v297_v3 = vld [vmem:[#allocation2 + $0x8] sm:$0xc] }
  0xe9   :  { %v208_v36 = vpop.f32.mrb[3].mxu1  ;;  %v213_v39 = vadd.f32 %v211_v38, %v205_v32 }
  0xea   :  { %v1821_v37 = vmul.f32 -1.442695, %v212_v35  ;;  %v392_v36 = vld [vmem:[#allocation2] sm:$0x30] }
  0xeb   :  { %v1822_v45 = vmul.f32 -1.442695, %v213_v39 }
  0xec   :  { %1961 = vpow2.f32 %v1821_v37 }
  0xed   :  { %1963 = vtanh.f32 %v213_v39 }
  0xf6   :  { %v1962_v40 = vpop.eup %1961 }
  0xf7   :  { %v217_v41 = vadd.f32 1.0, %v1962_v40  ;;  %v1964_v42 = vpop.eup %1963 }
  0xf9   :  { %1965 = vrcp.f32 %v217_v41 }
  0xfa   :  { %1967 = vpow2.f32 %v1822_v45 }
 0x103   :  { %v1966_v43 = vpop.eup %1965 }
 0x104   :  { %v228_v44 = vmul.f32 %v1966_v43, %v1964_v42  ;;  %v1968_v46 = vpop.eup %1967  ;;  %v227_v48 = vmul.f32 0.0, %v1966_v43  ;;  %v393_v42 = vld [vmem:[#allocation2 + $0x8] sm:$0x30] }
 0x105   :  { %v224_v47 = vadd.f32 1.0, %v1968_v46 }
 0x106   :  { %230 = vrot.lane.b32.xlu0 %v228_v44, %s2154_s3 }
 0x107   :  { %1969 = vrcp.f32 %v224_v47 }
 0x111   :  { %v1970_v51 = vpop.eup %1969 }
 0x178   :  { %v231_v49 = vpop.permute.xlu0 %230 }
 0x179   :  { %v233_v50 = vadd.f32 %v231_v49, %v227_v48 }
 0x17b   :  { %1971 = vtanh.f32 %v233_v50  ;;  %v320_v12 = vrot.slane %v233_v50, 6 }
 0x185   :  { %v1972_v52 = vpop.eup %1971 }
 0x186   :  { %v2296_v53 = vmul.f32 %v1972_v52, %v1970_v51 }
 0x188   :  { %v248_v54 = vpack.c.bf16 %v2296_v53, %v2296_v53  ;;  %243 = vst.msk [vmem:[#allocation3 + $0xe] sm:$0x3] %vm242_vm1, %v2296_v53 }
 0x18a   :  { %250 = vrot.lane.b32.xlu0 %v248_v54, %s2154_s3 }
 0x1fc   :  { %v251_v55 = vpop.permute.xlu0 %250 }
 0x1fd   :  { %1823 = vmatmul.mubr.msk.bf16.vlgmr.msra.gmra.mrb[4].mxu0 %vm165_vm2, %v251_v55 }
 0x1fe   :  { %448 = vmatpush1.bf16.msra.mxu0 %v2211_v4  ;;  %479 = vmatprep.mubr.bf16.mxu0 %v2153_v1 }
 0x1ff   :  { %449 = vmatprep.subr.bf16.mxu0 %v2221_v6 }
 0x202   :  { %450 = vmatpush1.bf16.msra.mxu0 %v2229_v8 }
 0x203   :  { %451 = vmatprep.subr.bf16.mxu0 %v2241_v11 }
 0x206   :  { %452 = vmatpush1.bf16.msra.mxu0 %v2247_v13 }
 0x207   :  { %453 = vmatprep.subr.bf16.mxu0 %v2253_v14 }
 0x20a   :  { %454 = vmatpush1.bf16.msra.mxu0 %v2260_v15 }
 0x20b   :  { %628 = vmatprep.subr.bf16.mxu0 %v2203_v2 }
 0x2d0   :  { %v289_v56 = vpop.f32.mrb[4].mxu0 }
 0x2d1   :  { %v300_v57 = vrot.slane %v289_v56, 6  ;;  %v291_v58 = vpop.f32.mrb[5].mxu0 }
 0x2d2   :  { %v293_v60 = vpop.f32.mrb[6].mxu0  ;;  %v301_v0 = vrot.slane %v291_v58, 6 }
 0x2d3   :  { %v304_v61 = vadd.f32 %v300_v57, %v296_v59  ;;  %v294_v62 = vpop.f32.mrb[7].mxu0 }
 0x2d4   :  { %v305_v5 = vadd.f32 %v301_v0, %v297_v3 }
 0x2d5   :  { %v1824_v63 = vmul.f32 -1.442695, %v304_v61 }
 0x2d6   :  { %v1825_v22 = vmul.f32 -1.442695, %v305_v5 }
 0x2d7   :  { %1973 = vpow2.f32 %v1824_v63 }
 0x2d8   :  { %1975 = vtanh.f32 %v305_v5  ;;  %v488_v5 = vld [vmem:[#allocation2] sm:$0xc0] }
 0x2e1   :  { %v1974_v7 = vpop.eup %1973 }
 0x2e2   :  { %v309_v9 = vadd.f32 1.0, %v1974_v7  ;;  %v1976_v10 = vpop.eup %1975 }
 0x2e4   :  { %1977 = vrcp.f32 %v309_v9 }
 0x2e5   :  { %1979 = vpow2.f32 %v1825_v22 }
 0x2ee   :  { %v1978_v16 = vpop.eup %1977 }
 0x2ef   :  { %v323_v19 = vmul.f32 %v1978_v16, %v1976_v10  ;;  %v322_v21 = vmul.f32 %v1978_v16, %v320_v12  ;;  %v1980_v23 = vpop.eup %1979 }
 0x2f0   :  { %v316_v24 = vadd.f32 1.0, %v1980_v23 }
 0x2f1   :  { %325 = vrot.lane.b32.xlu1 %v323_v19, %s2154_s3  ;;  %v489_v19 = vld [vmem:[#allocation2 + $0x8] sm:$0xc0] }
 0x2f2   :  { %1981 = vrcp.f32 %v316_v24 }
 0x2fc   :  { %v1982_v27 = vpop.eup %1981 }
 0x363   :  { %v326_v25 = vpop.permute.xlu1 %325 }
 0x364   :  { %v328_v26 = vadd.f32 %v326_v25, %v322_v21 }
 0x366   :  { %1983 = vtanh.f32 %v328_v26  ;;  %v416_v47 = vrot.slane %v328_v26, 6 }
 0x370   :  { %v1984_v28 = vpop.eup %1983 }
 0x371   :  { %v2314_v29 = vmul.f32 %v1984_v28, %v1982_v27 }
 0x373   :  { %v343_v30 = vpack.c.bf16 %v2314_v29, %v2314_v29  ;;  %338 = vst.msk [vmem:[#allocation3 + $0xa] sm:$0xc] %vm337_vm3, %v2314_v29 }
 0x375   :  { %v345_v31 = vrot.slane %v343_v30, 1 }
 0x377   :  { %346 = vrot.lane.b32.xlu1 %v345_v31, %s2154_s3 }
 0x3e9   :  { %v347_v32 = vpop.permute.xlu1 %346 }
 0x3ea   :  { %1826 = vmatmul.mubr.msk.bf16.vlgmr.msra.gmra.mrb[4].mxu1 %vm165_vm2, %v347_v32 }
 0x3eb   :  { %544 = vmatpush1.bf16.msra.mxu1 %v2211_v4  ;;  %575 = vmatprep.mubr.bf16.mxu1 %v2153_v1 }
 0x3ec   :  { %545 = vmatprep.subr.bf16.mxu1 %v2221_v6 }
 0x3ef   :  { %546 = vmatpush1.bf16.msra.mxu1 %v2229_v8 }
 0x3f0   :  { %547 = vmatprep.subr.bf16.mxu1 %v2241_v11 }
 0x3f3   :  { %548 = vmatpush1.bf16.msra.mxu1 %v2247_v13 }
 0x3f4   :  { %549 = vmatprep.subr.bf16.mxu1 %v2253_v14 }
 0x3f7   :  { %550 = vmatpush1.bf16.msra.mxu1 %v2260_v15 }
 0x3f8   :  { %720 = vmatprep.subr.bf16.mxu1 %v2203_v2 }
 0x4bd   :  { %v385_v33 = vpop.f32.mrb[4].mxu1 }
 0x4be   :  { %v396_v34 = vrot.slane %v385_v33, 4  ;;  %v387_v35 = vpop.f32.mrb[5].mxu1 }
 0x4bf   :  { %v389_v37 = vpop.f32.mrb[6].mxu1  ;;  %v397_v41 = vrot.slane %v387_v35, 4 }
 0x4c0   :  { %v400_v38 = vadd.f32 %v396_v34, %v392_v36  ;;  %v390_v39 = vpop.f32.mrb[7].mxu1 }
 0x4c1   :  { %v401_v43 = vadd.f32 %v397_v41, %v393_v42  ;;  %v584_v41 = vld [vmem:[#allocation2 + $0x10] sm:$0x3] }
 0x4c2   :  { %v1827_v40 = vmul.f32 -1.442695, %v400_v38 }
 0x4c3   :  { %v1828_v51 = vmul.f32 -1.442695, %v401_v43 }
 0x4c4   :  { %1985 = vpow2.f32 %v1827_v40 }
 0x4c5   :  { %1987 = vtanh.f32 %v401_v43 }
 0x4ce   :  { %v1986_v44 = vpop.eup %1985 }
 0x4cf   :  { %v405_v45 = vadd.f32 1.0, %v1986_v44  ;;  %v1988_v46 = vpop.eup %1987 }
 0x4d1   :  { %1989 = vrcp.f32 %v405_v45 }
 0x4d2   :  { %1991 = vpow2.f32 %v1828_v51 }
 0x4db   :  { %v1990_v48 = vpop.eup %1989 }
 0x4dc   :  { %v419_v49 = vmul.f32 %v1990_v48, %v1988_v46  ;;  %v418_v50 = vmul.f32 %v1990_v48, %v416_v47  ;;  %v1992_v52 = vpop.eup %1991  ;;  %v585_v47 = vld [vmem:[#allocation2 + $0x18] sm:$0x3] }
 0x4dd   :  { %v412_v54 = vadd.f32 1.0, %v1992_v52 }
 0x4de   :  { %421 = vrot.lane.b32.xlu0 %v419_v49, %s2154_s3 }
 0x4df   :  { %1993 = vrcp.f32 %v412_v54 }
 0x4e9   :  { %v1994_v57 = vpop.eup %1993 }
 0x550   :  { %v422_v55 = vpop.permute.xlu0 %421 }
 0x551   :  { %v424_v56 = vadd.f32 %v422_v55, %v418_v50 }
 0x553   :  { %1995 = vtanh.f32 %v424_v56  ;;  %v512_v25 = vrot.slane %v424_v56, 6 }
 0x55d   :  { %v1996_v58 = vpop.eup %1995 }
 0x55e   :  { %v2332_v59 = vmul.f32 %v1996_v58, %v1994_v57 }
 0x560   :  { %v439_v60 = vpack.c.bf16 %v2332_v59, %v2332_v59  ;;  %434 = vst.msk [vmem:[#allocation3 + $0x6] sm:$0x30] %vm433_vm4, %v2332_v59 }
 0x562   :  { %v441_v61 = vrot.slane %v439_v60, 2 }
 0x564   :  { %442 = vrot.lane.b32.xlu1 %v441_v61, %s2154_s3 }
 0x5d6   :  { %v443_v62 = vpop.permute.xlu1 %442 }
 0x5d7   :  { %1829 = vmatmul.mubr.msk.bf16.vlgmr.msra.gmra.mrb[8].mxu0 %vm165_vm2, %v443_v62 }
 0x5d8   :  { %629 = vmatpush1.bf16.msra.mxu0 %v2211_v4  ;;  %660 = vmatprep.mubr.bf16.mxu0 %v2153_v1 }
 0x5d9   :  { %630 = vmatprep.subr.bf16.mxu0 %v2221_v6 }
 0x5dc   :  { %631 = vmatpush1.bf16.msra.mxu0 %v2229_v8 }
 0x5dd   :  { %632 = vmatprep.subr.bf16.mxu0 %v2241_v11 }
 0x5e0   :  { %633 = vmatpush1.bf16.msra.mxu0 %v2247_v13 }
 0x5e1   :  { %634 = vmatprep.subr.bf16.mxu0 %v2253_v14 }
 0x5e4   :  { %635 = vmatpush1.bf16.msra.mxu0 %v2260_v15 }
 0x5e5   :  { %812 = vmatprep.subr.bf16.mxu0 %v2203_v2 }
 0x6aa   :  { %v481_v63 = vpop.f32.mrb[8].mxu0 }
 0x6ab   :  { %v492_v0 = vrot.slane %v481_v63, 2  ;;  %v483_v3 = vpop.f32.mrb[9].mxu0 }
 0x6ac   :  { %v485_v7 = vpop.f32.mrb[10].mxu0  ;;  %v493_v16 = vrot.slane %v483_v3, 2 }
 0x6ad   :  { %v496_v9 = vadd.f32 %v492_v0, %v488_v5  ;;  %v486_v10 = vpop.f32.mrb[11].mxu0 }
 0x6ae   :  { %v497_v21 = vadd.f32 %v493_v16, %v489_v19  ;;  %v669_v16 = vld [vmem:[#allocation2 + $0x10] sm:$0xc] }
 0x6af   :  { %v1830_v12 = vmul.f32 -1.442695, %v496_v9 }
 0x6b0   :  { %v1831_v28 = vmul.f32 -1.442695, %v497_v21 }
 0x6b1   :  { %1997 = vpow2.f32 %v1830_v12 }
 0x6b2   :  { %1999 = vtanh.f32 %v497_v21 }
 0x6bb   :  { %v1998_v22 = vpop.eup %1997 }
 0x6bc   :  { %v501_v23 = vadd.f32 1.0, %v1998_v22  ;;  %v2000_v24 = vpop.eup %1999 }
 0x6be   :  { %2001 = vrcp.f32 %v501_v23  ;;  %v670_v23 = vld [vmem:[#allocation2 + $0x18] sm:$0xc] }
 0x6bf   :  { %2003 = vpow2.f32 %v1831_v28 }
 0x6c8   :  { %v2002_v26 = vpop.eup %2001 }
 0x6c9   :  { %v515_v2 = vmul.f32 %v2002_v26, %v2000_v24  ;;  %v514_v27 = vmul.f32 %v2002_v26, %v512_v25  ;;  %v2004_v30 = vpop.eup %2003 }
 0x6ca   :  { %v508_v31 = vadd.f32 1.0, %v2004_v30 }
 0x6cb   :  { %517 = vrot.lane.b32.xlu0 %v515_v2, %s2154_s3 }
 0x6cc   :  { %2005 = vrcp.f32 %v508_v31 }
 0x6d6   :  { %v2006_v34 = vpop.eup %2005 }
 0x73d   :  { %v518_v32 = vpop.permute.xlu0 %517 }
 0x73e   :  { %v520_v33 = vadd.f32 %v518_v32, %v514_v27 }
 0x740   :  { %2007 = vtanh.f32 %v520_v33  ;;  %v602_v52 = vrot.slane %v520_v33, 6 }
 0x74a   :  { %v2008_v35 = vpop.eup %2007 }
 0x74b   :  { %v2350_v36 = vmul.f32 %v2008_v35, %v2006_v34 }
 0x74d   :  { %v535_v37 = vpack.c.bf16 %v2350_v36, %v2350_v36  ;;  %530 = vst.msk [vmem:[#allocation3 + $0x2] sm:$0xc0] %vm529_vm5, %v2350_v36 }
 0x74f   :  { %v537_v38 = vrot.slane %v535_v37, 3 }
 0x751   :  { %538 = vrot.lane.b32.xlu1 %v537_v38, %s2154_s3 }
 0x7c3   :  { %v539_v39 = vpop.permute.xlu1 %538 }
 0x7c4   :  { %1832 = vmatmul.mubr.msk.bf16.vlgmr.msra.gmra.mrb[8].mxu1 %vm165_vm2, %v539_v39 }
 0x7c5   :  { %721 = vmatpush1.bf16.msra.mxu1 %v2211_v4  ;;  %752 = vmatprep.mubr.bf16.mxu1 %v2153_v1 }
 0x7c6   :  { %722 = vmatprep.subr.bf16.mxu1 %v2221_v6 }
 0x7c9   :  { %723 = vmatpush1.bf16.msra.mxu1 %v2229_v8 }
 0x7ca   :  { %724 = vmatprep.subr.bf16.mxu1 %v2241_v11 }
 0x7cd   :  { %725 = vmatpush1.bf16.msra.mxu1 %v2247_v13 }
 0x7ce   :  { %726 = vmatprep.subr.bf16.mxu1 %v2253_v14 }
 0x7d1   :  { %727 = vmatpush1.bf16.msra.mxu1 %v2260_v15 }
 0x897   :  { %v577_v40 = vpop.f32.mrb[8].mxu1 }
 0x898   :  { %v586_v42 = vadd.f32 %v584_v41, %v577_v40  ;;  %v579_v43 = vpop.f32.mrb[9].mxu1 }
 0x899   :  { %v581_v44 = vpop.f32.mrb[10].mxu1  ;;  %v587_v48 = vadd.f32 %v585_v47, %v579_v43 }
 0x89a   :  { %v1833_v45 = vmul.f32 -1.442695, %v586_v42  ;;  %v582_v46 = vpop.f32.mrb[11].mxu1  ;;  %v761_v42 = vld [vmem:[#allocation2 + $0x10] sm:$0x30] }
 0x89b   :  { %v1834_v57 = vmul.f32 -1.442695, %v587_v48 }
 0x89c   :  { %2009 = vpow2.f32 %v1833_v45 }
 0x89d   :  { %2011 = vtanh.f32 %v587_v48  ;;  %v762_v48 = vld [vmem:[#allocation2 + $0x18] sm:$0x30] }
 0x8a6   :  { %v2010_v49 = vpop.eup %2009 }
 0x8a7   :  { %v591_v50 = vadd.f32 1.0, %v2010_v49  ;;  %v2012_v51 = vpop.eup %2011 }
 0x8a9   :  { %2013 = vrcp.f32 %v591_v50 }
 0x8aa   :  { %2015 = vpow2.f32 %v1834_v57 }
 0x8b3   :  { %v2014_v54 = vpop.eup %2013 }
 0x8b4   :  { %v605_v55 = vmul.f32 %v2014_v54, %v2012_v51  ;;  %v604_v56 = vmul.f32 %v2014_v54, %v602_v52  ;;  %v2016_v58 = vpop.eup %2015 }
 0x8b5   :  { %v598_v60 = vadd.f32 1.0, %v2016_v58 }
 0x8b6   :  { %607 = vrot.lane.b32.xlu0 %v605_v55, %s2154_s3 }
 0x8b7   :  { %2017 = vrcp.f32 %v598_v60 }
 0x8c1   :  { %v2018_v63 = vpop.eup %2017 }
 0x928   :  { %v608_v61 = vpop.permute.xlu0 %607 }
 0x929   :  { %v610_v62 = vadd.f32 %v608_v61, %v604_v56 }
 0x92b   :  { %2019 = vtanh.f32 %v610_v62 }
 0x935   :  { %v2020_v0 = vpop.eup %2019 }
 0x936   :  { %v2367_v3 = vmul.f32 %v2020_v0, %v2018_v63 }
 0x938   :  { %v621_v5 = vpack.c.bf16 %v2367_v3, %v2367_v3 }
 0x93a   :  { %623 = vrot.lane.b32.xlu1 %v621_v5, %s2154_s3 }
 0x9ac   :  { %v624_v7 = vpop.permute.xlu1 %623 }
 0x9ad   :  { %1835 = vmatmul.mubr.msk.bf16.vlgmr.msra.gmra.mrb[12].mxu0 %vm165_vm2, %v624_v7 }
 0x9ae   :  { %813 = vmatpush1.bf16.msra.mxu0 %v2211_v4  ;;  %844 = vmatprep.mubr.bf16.mxu0 %v2153_v1 }
 0x9af   :  { %814 = vmatprep.subr.bf16.mxu0 %v2221_v6 }
 0x9b2   :  { %815 = vmatpush1.bf16.msra.mxu0 %v2229_v8 }
 0x9b3   :  { %816 = vmatprep.subr.bf16.mxu0 %v2241_v11 }
 0x9b6   :  { %817 = vmatpush1.bf16.msra.mxu0 %v2247_v13 }
 0x9b7   :  { %818 = vmatprep.subr.bf16.mxu0 %v2253_v14  ;;  %v693_v14 = vrot.slane %v610_v62, 6 }
 0x9ba   :  { %819 = vmatpush1.bf16.msra.mxu0 %v2260_v15 }
 0xa80   :  { %v662_v9 = vpop.f32.mrb[12].mxu0 }
 0xa81   :  { %v673_v10 = vrot.slane %v662_v9, 6  ;;  %v664_v12 = vpop.f32.mrb[13].mxu0 }
 0xa82   :  { %v666_v19 = vpop.f32.mrb[14].mxu0  ;;  %v674_v6 = vrot.slane %v664_v12, 6 }
 0xa83   :  { %v677_v4 = vadd.f32 %v673_v10, %v669_v16  ;;  %v667_v21 = vpop.f32.mrb[15].mxu0 }
 0xa84   :  { %v678_v8 = vadd.f32 %v674_v6, %v670_v23  ;;  %v853_v6 = vld [vmem:[#allocation2 + $0x10] sm:$0xc0] }
 0xa85   :  { %v1836_v22 = vmul.f32 -1.442695, %v677_v4 }
 0xa86   :  { %v1837_v2 = vmul.f32 -1.442695, %v678_v8 }
 0xa87   :  { %2021 = vpow2.f32 %v1836_v22 }
 0xa88   :  { %2023 = vtanh.f32 %v678_v8 }
 0xa91   :  { %v2022_v24 = vpop.eup %2021 }
 0xa92   :  { %v682_v11 = vadd.f32 1.0, %v2022_v24  ;;  %v2024_v13 = vpop.eup %2023 }
 0xa94   :  { %2025 = vrcp.f32 %v682_v11 }
 0xa95   :  { %2027 = vpow2.f32 %v1837_v2 }
 0xa9e   :  { %v2026_v25 = vpop.eup %2025 }
 0xa9f   :  { %v696_v15 = vmul.f32 %v2026_v25, %v2024_v13  ;;  %v695_v26 = vmul.f32 %v2026_v25, %v693_v14  ;;  %v2028_v27 = vpop.eup %2027  ;;  %v854_v13 = vld [vmem:[#allocation2 + $0x18] sm:$0xc0] }
 0xaa0   :  { %v689_v28 = vadd.f32 1.0, %v2028_v27 }
 0xaa1   :  { %698 = vrot.lane.b32.xlu0 %v696_v15, %s2154_s3 }
 0xaa2   :  { %2029 = vrcp.f32 %v689_v28 }
 0xaac   :  { %v2030_v32 = vpop.eup %2029 }
 0xb13   :  { %v699_v30 = vpop.permute.xlu0 %698 }
 0xb14   :  { %v701_v31 = vadd.f32 %v699_v30, %v695_v26  ;;  %v1925_v30 = vld [vmem:[%s2746_s4] ss:$8 sps:$4 sm:$0xff]  }
 0xb16   :  { %2031 = vtanh.f32 %v701_v31  ;;  %v785_v54 = vrot.slane %v701_v31, 6  ;;  %v1927_v31 = vld [vmem:[%s2746_s4 + $0x4] ss:$8 sps:$4 sm:$0xff]  }
 0xb17   :  { %1015 = vmatprep.subr.bf16.mxu1 %v1927_v31 }
 0xb20   :  { %v2032_v33 = vpop.eup %2031 }
 0xb21   :  { %v2382_v34 = vmul.f32 %v2032_v33, %v2030_v32  ;;  %v1930_v32 = vld [vmem:[%s2746_s4 + $0x14] ss:$8 sps:$4 sm:$0xff]   ;;  %v1928_v33 = vld [vmem:[%s2746_s4 + $0x10] ss:$8 sps:$4 sm:$0xff]  }
 0xb23   :  { %v712_v35 = vpack.c.bf16 %v2382_v34, %v2382_v34 }
 0xb25   :  { %v714_v37 = vrot.slane %v712_v35, 1  ;;  %v1933_v35 = vld [vmem:[%s2746_s4 + $0x24] ss:$8 sps:$4 sm:$0xff]  }
 0xb27   :  { %715 = vrot.lane.b32.xlu1 %v714_v37, %s2154_s3  ;;  %v1931_v37 = vld [vmem:[%s2746_s4 + $0x20] ss:$8 sps:$4 sm:$0xff]  }
 0xb99   :  { %v716_v38 = vpop.permute.xlu1 %715 }
 0xb9a   :  { %1838 = vmatmul.mubr.msk.bf16.vlgmr.msra.gmra.mrb[12].mxu1 %vm165_vm2, %v716_v38  ;;  %v1936_v38 = vld [vmem:[%s2746_s4 + $0x34] ss:$8 sps:$4 sm:$0xff]  }
 0xb9b   :  { %1047 = vmatprep.mubr.bf16.mxu1 %v2153_v1  ;;  %1016 = vmatpush1.bf16.msra.mxu1 %v1925_v30 }
 0xb9c   :  { %1017 = vmatprep.subr.bf16.mxu1 %v1930_v32 }
 0xb9f   :  { %1018 = vmatpush1.bf16.msra.mxu1 %v1928_v33 }
 0xba0   :  { %1019 = vmatprep.subr.bf16.mxu1 %v1933_v35 }
 0xba3   :  { %1020 = vmatpush1.bf16.msra.mxu1 %v1931_v37 }
 0xba4   :  { %1021 = vmatprep.subr.bf16.mxu1 %v1936_v38 }
 0xc6d   :  { %v754_v39 = vpop.f32.mrb[12].mxu1 }
 0xc6e   :  { %v765_v40 = vrot.slane %v754_v39, 4  ;;  %v756_v41 = vpop.f32.mrb[13].mxu1  ;;  %v1934_v39 = vld [vmem:[%s2746_s4 + $0x30] ss:$8 sps:$4 sm:$0xff]  }
 0xc6f   :  { %v758_v43 = vpop.f32.mrb[14].mxu1  ;;  %v766_v47 = vrot.slane %v756_v41, 4  ;;  %1022 = vmatpush1.bf16.msra.mxu1 %v1934_v39  ;;  %v1937_v41 = vld [vmem:[%s2746_s4 + $0x40] ss:$8 sps:$4 sm:$0xff]  }
 0xc70   :  { %v769_v44 = vadd.f32 %v765_v40, %v761_v42  ;;  %v759_v45 = vpop.f32.mrb[15].mxu1  ;;  %v1939_v40 = vld [vmem:[%s2746_s4 + $0x44] ss:$8 sps:$4 sm:$0xff]   ;;  %v1942_v42 = vld [vmem:[%s2746_s4 + $0x54] ss:$8 sps:$4 sm:$0xff]  }
 0xc71   :  { %v770_v49 = vadd.f32 %v766_v47, %v762_v48  ;;  %1023 = vmatprep.subr.bf16.mxu1 %v1939_v40  ;;  %v1940_v43 = vld [vmem:[%s2746_s4 + $0x50] ss:$8 sps:$4 sm:$0xff]  }
 0xc72   :  { %v1839_v46 = vmul.f32 -1.442695, %v769_v44 }
 0xc73   :  { %v1840_v58 = vmul.f32 -1.442695, %v770_v49  ;;  %1024 = vmatpush1.bf16.msra.mxu1 %v1937_v41 }
 0xc74   :  { %2033 = vpow2.f32 %v1839_v46  ;;  %1025 = vmatprep.subr.bf16.mxu1 %v1942_v42 }
 0xc75   :  { %2035 = vtanh.f32 %v770_v49 }
 0xc77   :  { %1026 = vmatpush1.bf16.msra.mxu1 %v1940_v43 }
 0xc7e   :  { %v2034_v50 = vpop.eup %2033 }
 0xc7f   :  { %v774_v51 = vadd.f32 1.0, %v2034_v50  ;;  %v2036_v52 = vpop.eup %2035 }
 0xc81   :  { %2037 = vrcp.f32 %v774_v51  ;;  %v1945_v51 = vld [vmem:[%s2746_s4 + $0x60] ss:$8 sps:$4 sm:$0xff]  }
 0xc82   :  { %2039 = vpow2.f32 %v1840_v58  ;;  %v1953_v58 = vld [vmem:[%s2746_s4 + $0x74] ss:$8 sps:$4 sm:$0xff]  }
 0xc8b   :  { %v2038_v55 = vpop.eup %2037 }
 0xc8c   :  { %v788_v56 = vmul.f32 %v2038_v55, %v2036_v52  ;;  %v787_v57 = vmul.f32 %v2038_v55, %v785_v54  ;;  %v2040_v60 = vpop.eup %2039  ;;  %v1947_v52 = vld [vmem:[%s2746_s4 + $0x64] ss:$8 sps:$4 sm:$0xff]  }
 0xc8d   :  { %v781_v61 = vadd.f32 1.0, %v2040_v60  ;;  %v2469_v55 = vld [vmem:[%s2747_s5 + $0x4] ss:$8 sps:$4 sm:$0xff]   ;;  %1027 = vmatprep.subr.bf16.mxu1 %v1947_v52 }
 0xc8e   :  { %790 = vrot.lane.b32.xlu0 %v788_v56, %s2154_s3  ;;  %v2477_v56 = vld [vmem:[%s2747_s5] ss:$8 sps:$4 sm:$0xff]   ;;  %1102 = vmatprep.subr.bf16.mxu0 %v2469_v55 }
 0xc8f   :  { %2041 = vrcp.f32 %v781_v61  ;;  %1028 = vmatpush1.bf16.msra.mxu1 %v1945_v51  ;;  %v2500_v61 = vld [vmem:[%s2747_s5 + $0x10] ss:$8 sps:$4 sm:$0xff]  }
 0xc90   :  { %1029 = vmatprep.subr.bf16.mxu1 %v1953_v58 }
 0xc99   :  { %v2042_v0 = vpop.eup %2041 }
 0xd00   :  { %v791_v62 = vpop.permute.xlu0 %790 }
 0xd01   :  { %v793_v63 = vadd.f32 %v791_v62, %v787_v57  ;;  %v1951_v57 = vld [vmem:[%s2746_s4 + $0x70] ss:$8 sps:$4 sm:$0xff]   ;;  %v2508_v62 = vld [vmem:[%s2747_s5 + $0x24] ss:$8 sps:$4 sm:$0xff]  }
 0xd02   :  { %1030 = vmatpush1.bf16.msra.mxu1 %v1951_v57 }
 0xd03   :  { %2043 = vtanh.f32 %v793_v63  ;;  %v877_v26 = vrot.slane %v793_v63, 6  ;;  %1275 = vmatprep.subr.bf16.mxu1 %v2469_v55 }
 0xd0d   :  { %v2044_v5 = vpop.eup %2043 }
 0xd0e   :  { %v2390_v7 = vmul.f32 %v2044_v5, %v2042_v0 }
 0xd10   :  { %v804_v9 = vpack.c.bf16 %v2390_v7, %v2390_v7 }
 0xd12   :  { %v806_v10 = vrot.slane %v804_v9, 2 }
 0xd14   :  { %807 = vrot.lane.b32.xlu1 %v806_v10, %s2154_s3 }
 0xd18   :  { %237 = vrot.lane.b32.xlu1 %v2296_v53, %s2154_s3 }
 0xd1c   :  { %428 = vrot.lane.b32.xlu1 %v2332_v59, %s2154_s3 }
 0xd20   :  { %614 = vrot.lane.b32.xlu1 %v2367_v3, %s2154_s3 }
 0xd24   :  { %797 = vrot.lane.b32.xlu1 %v2390_v7, %s2154_s3 }
 0xd86   :  { %v808_v12 = vpop.permute.xlu1 %807 }
 0xd87   :  { %1841 = vmatmul.mubr.msk.bf16.vlgmr.msra.gmra.mrb[16].mxu0 %vm165_vm2, %v808_v12 }
 0xd88   :  { %1134 = vmatprep.mubr.bf16.mxu0 %v2153_v1  ;;  %1103 = vmatpush1.bf16.msra.mxu0 %v2477_v56 }
 0xd8a   :  { %v238_v16 = vpop.permute.xlu1 %237 }
 0xd8b   :  { %241 = vst.msk [vmem:[#allocation3] sm:$0x3] %vm240_vm6, %v238_v16 }
 0xd8c   :  { %245 = vst.msk [vmem:[#allocation3 + $0xe] sm:$0x3] %vm244_vm7, %v238_v16 }
 0xd8d   :  { %247 = vst.msk [vmem:[#allocation3] sm:$0x3] %vm246_vm8, %v2296_v53 }
 0xd8e   :  { %v429_v19 = vpop.permute.xlu1 %428 }
 0xd8f   :  { %432 = vst.msk [vmem:[#allocation3] sm:$0x30] %vm431_vm9, %v429_v19 }
 0xd90   :  { %436 = vst.msk [vmem:[#allocation3 + $0x6] sm:$0x30] %vm435_vm10, %v429_v19 }
 0xd91   :  { %438 = vst.msk [vmem:[#allocation3] sm:$0x30] %vm437_vm11, %v2332_v59 }
 0xd92   :  { %709 = vst.msk [vmem:[#allocation3 + $0x2] sm:$0xc] %vm337_vm3, %v2382_v34  ;;  %v615_v47 = vpop.permute.xlu1 %614  ;;  %vm533_vm3 = vcmask 1048326  }
 0xd96   :  { %v798_v54 = vpop.permute.xlu1 %797 }
 0xe5a   :  { %v846_v4 = vpop.f32.mrb[16].mxu0 }
 0xe5b   :  { %v857_v21 = vrot.slane %v846_v4, 2  ;;  %v848_v22 = vpop.f32.mrb[17].mxu0 }
 0xe5c   :  { %v850_v23 = vpop.f32.mrb[18].mxu0  ;;  %v858_v11 = vrot.slane %v848_v22, 2 }
 0xe5d   :  { %v861_v53 = vadd.f32 %v857_v21, %v853_v6  ;;  %v851_v8 = vpop.f32.mrb[19].mxu0  ;;  %v920_v6 = vld [vmem:[%s2748_s6] sm:$0x3] }
 0xe5e   :  { %v862_v14 = vadd.f32 %v858_v11, %v854_v13  ;;  %v928_v23 = vrot.slane %v920_v6, %v46_v18 }
 0xe5f   :  { %v1842_v24 = vmul.f32 -1.442695, %v861_v53  ;;  %v932_v53 = vrot.slane %v920_v6, %v50_v20 }
 0xe60   :  { %v1843_v44 = vmul.f32 -1.442695, %v862_v14 }
 0xe61   :  { %2045 = vpow2.f32 %v1842_v24 }
 0xe62   :  { %2047 = vtanh.f32 %v862_v14 }
 0xe6b   :  { %v2046_v25 = vpop.eup %2045 }
 0xe6c   :  { %v866_v15 = vadd.f32 1.0, %v2046_v25  ;;  %v2048_v59 = vpop.eup %2047 }
 0xe6e   :  { %2049 = vrcp.f32 %v866_v15 }
 0xe6f   :  { %2051 = vpow2.f32 %v1843_v44 }
 0xe78   :  { %v2050_v2 = vpop.eup %2049 }
 0xe79   :  { %v880_v27 = vmul.f32 %v2050_v2, %v2048_v59  ;;  %v879_v28 = vmul.f32 %v2050_v2, %v877_v26  ;;  %v2052_v45 = vpop.eup %2051 }
 0xe7a   :  { %v873_v46 = vadd.f32 1.0, %v2052_v45 }
 0xe7b   :  { %882 = vrot.lane.b32.xlu0 %v880_v27, %s2154_s3 }
 0xe7c   :  { %2053 = vrcp.f32 %v873_v46 }
 0xe7f   :  { %332 = vrot.lane.b32.xlu0 %v2314_v29, %s2154_s3 }
 0xe83   :  { %524 = vrot.lane.b32.xlu0 %v2350_v36, %s2154_s3 }
 0xe86   :  { %v2054_v63 = vpop.eup %2053 }
 0xe87   :  { %705 = vrot.lane.b32.xlu0 %v2382_v34, %s2154_s3 }
 0xeed   :  { %v883_v48 = vpop.permute.xlu0 %882 }
 0xeee   :  { %v885_v49 = vadd.f32 %v883_v48, %v879_v28 }
 0xef0   :  { %2055 = vtanh.f32 %v885_v49 }
 0xef1   :  { %v333_v50 = vpop.permute.xlu0 %332 }
 0xef2   :  { %336 = vst.msk [vmem:[#allocation3] sm:$0xc] %vm335_vm12, %v333_v50 }
 0xef3   :  { %340 = vst.msk [vmem:[#allocation3 + $0xa] sm:$0xc] %vm339_vm13, %v333_v50 }
 0xef4   :  { %342 = vst.msk [vmem:[#allocation3] sm:$0xc] %vm341_vm14, %v2314_v29  ;;  %v2487_v29 = vld [vmem:[%s2747_s5 + $0x14] ss:$8 sps:$4 sm:$0xff]  }
 0xef5   :  { %800 = vst.msk [vmem:[#allocation3 + $0x8] sm:$0x30] %vm431_vm9, %v798_v54  ;;  %v525_v60 = vpop.permute.xlu0 %524  ;;  %1104 = vmatprep.subr.bf16.mxu0 %v2487_v29 }
 0xef6   :  { %801 = vst.msk [vmem:[#allocation3 - $0x2] sm:$0x30] %vm433_vm4, %v2390_v7  ;;  %1105 = vmatpush1.bf16.msra.mxu0 %v2500_v61 }
 0xef7   :  { %803 = vst.msk [vmem:[#allocation3 + $0x8] sm:$0x30] %vm437_vm11, %v2390_v7  ;;  %1106 = vmatprep.subr.bf16.mxu0 %v2508_v62  ;;  %v2533_v7 = vld [vmem:[%s2747_s5 + $0x34] ss:$8 sps:$4 sm:$0xff]  }
 0xef8   :  { %802 = vst.msk [vmem:[#allocation3 - $0x2] sm:$0x30] %vm435_vm10, %v798_v54 }
 0xef9   :  { %528 = vst.msk [vmem:[#allocation3] sm:$0xc0] %vm527_vm15, %v525_v60  ;;  %v706_v0 = vpop.permute.xlu0 %705 }
 0xefa   :  { %532 = vst.msk [vmem:[#allocation3 + $0x2] sm:$0xc0] %vm531_vm0, %v525_v60  ;;  %v2056_v5 = vpop.eup %2055 }
 0xefb   :  { %534 = vst.msk [vmem:[#allocation3] sm:$0xc0] %vm533_vm3, %v2350_v36  ;;  %v887_v36 = vmul.f32 %v2056_v5, %v2054_v63 }
 0xefc   :  { %617 = vst.msk [vmem:[#allocation3 + $0x8] sm:$0x3] %vm240_vm6, %v615_v47 }
 0xefd   :  { %618 = vst.msk [vmem:[#allocation3 + $0x6] sm:$0x3] %vm242_vm1, %v2367_v3  ;;  %889 = vrot.lane.b32.xlu0 %v887_v36, %s2154_s3 }
 0xefe   :  { %620 = vst.msk [vmem:[#allocation3 + $0x8] sm:$0x3] %vm246_vm8, %v2367_v3  ;;  %v2528_v3 = vld [vmem:[%s2747_s5 + $0x20] ss:$8 sps:$4 sm:$0xff]  }
 0xeff   :  { %619 = vst.msk [vmem:[#allocation3 + $0x6] sm:$0x3] %vm244_vm7, %v615_v47  ;;  %1107 = vmatpush1.bf16.msra.mxu0 %v2528_v3 }
 0xf00   :  { %708 = vst.msk [vmem:[#allocation3 + $0x8] sm:$0xc] %vm335_vm12, %v706_v0  ;;  %1108 = vmatprep.subr.bf16.mxu0 %v2533_v7 }
 0xf01   :  { %710 = vst.msk [vmem:[#allocation3 + $0x2] sm:$0xc] %vm339_vm13, %v706_v0 }
 0xf02   :  { %711 = vst.msk [vmem:[#allocation3 + $0x8] sm:$0xc] %vm341_vm14, %v2382_v34  ;;  %v2541_v34 = vld [vmem:[%s2747_s5 + $0x30] ss:$8 sps:$4 sm:$0xff]  }
 0xf03   :  { %893 = vst.msk [vmem:[#allocation3 - $0x6] sm:$0xc0] %vm529_vm5, %v887_v36  ;;  %1109 = vmatpush1.bf16.msra.mxu0 %v2541_v34 }
 0xf04   :  { %1183 = vmatprep.subr.bf16.mxu0 %v2469_v55 }
 0xf06   :  { %1135 = vmatmul.mubr.bf16.vlgmr.msra.gmra.mrb[20].mxu0 %v2153_v1 }
 0xf07   :  { %1184 = vmatpush1.bf16.msra.mxu0 %v2477_v56  ;;  %1215 = vmatprep.mubr.bf16.mxu0 %v2153_v1 }
 0xf08   :  { %1185 = vmatprep.subr.bf16.mxu0 %v2487_v29 }
 0xf0b   :  { %1186 = vmatpush1.bf16.msra.mxu0 %v2500_v61 }
 0xf0c   :  { %1187 = vmatprep.subr.bf16.mxu0 %v2508_v62 }
 0xf0f   :  { %1188 = vmatpush1.bf16.msra.mxu0 %v2528_v3 }
 0xf10   :  { %1189 = vmatprep.subr.bf16.mxu0 %v2533_v7 }
 0xf13   :  { %1190 = vmatpush1.bf16.msra.mxu0 %v2541_v34 }
 0xf14   :  { %1367 = vmatprep.subr.bf16.mxu0 %v2469_v55 }
 0xf6f   :  { %v890_v9 = vpop.permute.xlu0 %889 }
 0xf70   :  { %892 = vst.msk [vmem:[#allocation3 + $0x8] sm:$0xc0] %vm527_vm15, %v890_v9 }
 0xf71   :  { %894 = vst.msk [vmem:[#allocation3 - $0x6] sm:$0xc0] %vm531_vm0, %v890_v9 }
 0xf72   :  { %895 = vst.msk [vmem:[#allocation3 + $0x8] sm:$0xc0] %vm533_vm3, %v887_v36 }
 0xf78   :  { %v921_v10 = vld [vmem:[#allocation3] sm:$0xff] }
 0xf79   :  { %v922_v12 = vld [vmem:[#allocation3 + $0x8] sm:$0xff] }
 0xf7a   :  { %v923_v16 = vpack.c.bf16 %v922_v12, %v921_v10 }
 0xf7c   :  { %1048 = vmatmul.mubr.bf16.vlgmr.msra.gmra.mrb[16].mxu1 %v923_v16 }
 0xf7d   :  { %1276 = vmatpush1.bf16.msra.mxu1 %v2477_v56  ;;  %1307 = vmatprep.mubr.bf16.mxu1 %v2153_v1 }
 0xf7e   :  { %1277 = vmatprep.subr.bf16.mxu1 %v2487_v29 }
 0xf81   :  { %1278 = vmatpush1.bf16.msra.mxu1 %v2500_v61 }
 0xf82   :  { %1279 = vmatprep.subr.bf16.mxu1 %v2508_v62 }
 0xf85   :  { %1280 = vmatpush1.bf16.msra.mxu1 %v2528_v3 }
 0xf86   :  { %1281 = vmatprep.subr.bf16.mxu1 %v2533_v7 }
 0xf89   :  { %1282 = vmatpush1.bf16.msra.mxu1 %v2541_v34 }
 0xf8a   :  { %1459 = vmatprep.subr.bf16.mxu1 %v2469_v55 }
 0xfd9   :  { %v1136_v19 = vpop.f32.mrb[20].mxu0 }
 0xfda   :  { %v1138_v4 = vpop.f32.mrb[21].mxu0 }
 0xfdb   :  { %v1140_v21 = vpop.f32.mrb[22].mxu0 }
 0xfdc   :  { %v1141_v22 = vpop.f32.mrb[23].mxu0 }
0x104f   :  { %v1049_v8 = vpop.f32.mrb[16].mxu1 }
0x1050   :  { %v1050_v24 = vadd.f32 %v1049_v8, %v928_v23  ;;  %v1051_v11 = vpop.f32.mrb[17].mxu1 }
0x1051   :  { %v1052_v13 = vadd.f32 %v1051_v11, %v932_v53  ;;  %v1053_v14 = vpop.f32.mrb[18].mxu1 }
0x1052   :  { %1058 = vst [vmem:[#allocation2] sm:$0xff] %v1050_v24  ;;  %v1054_v25 = vadd.f32 %v1053_v14, %v928_v23  ;;  %v1055_v15 = vpop.f32.mrb[19].mxu1 }
0x1053   :  { %1059 = vst [vmem:[#allocation2 + $0x8] sm:$0xff] %v1052_v13  ;;  %v1056_v59 = vadd.f32 %v1055_v15, %v932_v53 }
0x1054   :  { %1060 = vst [vmem:[#allocation2 + $0x10] sm:$0xff] %v1054_v25 }
0x1055   :  { %1061 = vst [vmem:[#allocation2 + $0x18] sm:$0xff] %v1056_v59 }
0x1059   :  { %v1143_v26 = vld [vmem:[#allocation2] sm:$0x3]  ;;  %v1224_v49 = vld [vmem:[#allocation2] sm:$0xc]  ;;  %v1316_v15 = vld [vmem:[#allocation2] sm:$0x30] }
0x105a   :  { %v1145_v2 = vadd.f32 %v1143_v26, %v1136_v19  ;;  %v1144_v18 = vld [vmem:[#allocation2 + $0x8] sm:$0x3]  ;;  %v1225_v58 = vld [vmem:[#allocation2 + $0x8] sm:$0xc] }
0x105b   :  { %v1146_v28 = vadd.f32 %v1144_v18, %v1138_v4 }
0x105c   :  { %v1868_v27 = vmul.f32 -1.442695, %v1145_v2 }
0x105d   :  { %v1869_v33 = vmul.f32 -1.442695, %v1146_v28 }
0x105e   :  { %2057 = vpow2.f32 %v1868_v27 }
0x105f   :  { %2059 = vtanh.f32 %v1146_v28  ;;  %v1317_v28 = vld [vmem:[#allocation2 + $0x8] sm:$0x30] }
0x1068   :  { %v2058_v17 = vpop.eup %2057 }
0x1069   :  { %v1150_v20 = vadd.f32 1.0, %v2058_v17  ;;  %v2060_v30 = vpop.eup %2059 }
0x106b   :  { %2061 = vrcp.f32 %v1150_v20 }
0x106c   :  { %2063 = vpow2.f32 %v1869_v33 }
0x1075   :  { %v2062_v31 = vpop.eup %2061 }
0x1076   :  { %v1161_v32 = vmul.f32 %v2062_v31, %v2060_v30  ;;  %v2064_v35 = vpop.eup %2063  ;;  %v1160_v38 = vmul.f32 0.0, %v2062_v31 }
0x1077   :  { %v1157_v37 = vadd.f32 1.0, %v2064_v35 }
0x1078   :  { %1163 = vrot.lane.b32.xlu1 %v1161_v32, %s2154_s3 }
0x1079   :  { %2065 = vrcp.f32 %v1157_v37 }
0x1083   :  { %v2066_v41 = vpop.eup %2065 }
0x10ea   :  { %v1164_v39 = vpop.permute.xlu1 %1163 }
0x10eb   :  { %v1166_v40 = vadd.f32 %v1164_v39, %v1160_v38 }
0x10ed   :  { %2067 = vtanh.f32 %v1166_v40  ;;  %v1248_v36 = vrot.slane %v1166_v40, 6 }
0x10f7   :  { %v2068_v42 = vpop.eup %2067 }
0x10f8   :  { %v2576_v43 = vmul.f32 %v2068_v42, %v2066_v41 }
0x10fa   :  { %v1176_v44 = vpack.c.bf16 %v2576_v43, %v2576_v43 }
0x10fc   :  { %1178 = vrot.lane.b32.xlu0 %v1176_v44, %s2154_s3 }
0x116e   :  { %v1179_v45 = vpop.permute.xlu0 %1178 }
0x116f   :  { %1871 = vmatmul.mubr.msk.bf16.vlgmr.msra.gmra.mrb[24].mxu0 %vm165_vm2, %v1179_v45 }
0x1170   :  { %1368 = vmatpush1.bf16.msra.mxu0 %v2477_v56  ;;  %1399 = vmatprep.mubr.bf16.mxu0 %v2153_v1 }
0x1171   :  { %1369 = vmatprep.subr.bf16.mxu0 %v2487_v29 }
0x1174   :  { %1370 = vmatpush1.bf16.msra.mxu0 %v2500_v61 }
0x1175   :  { %1371 = vmatprep.subr.bf16.mxu0 %v2508_v62 }
0x1178   :  { %1372 = vmatpush1.bf16.msra.mxu0 %v2528_v3 }
0x1179   :  { %1373 = vmatprep.subr.bf16.mxu0 %v2533_v7 }
0x117c   :  { %1374 = vmatpush1.bf16.msra.mxu0 %v2541_v34 }
0x117d   :  { %1542 = vmatprep.subr.bf16.mxu0 %v2469_v55 }
0x1242   :  { %v1217_v46 = vpop.f32.mrb[24].mxu0 }
0x1243   :  { %v1228_v47 = vrot.slane %v1217_v46, 6  ;;  %v1219_v48 = vpop.f32.mrb[25].mxu0 }
0x1244   :  { %v1221_v50 = vpop.f32.mrb[26].mxu0  ;;  %v1229_v57 = vrot.slane %v1219_v48, 6 }
0x1245   :  { %v1232_v51 = vadd.f32 %v1228_v47, %v1224_v49  ;;  %v1222_v52 = vpop.f32.mrb[27].mxu0 }
0x1246   :  { %v1233_v60 = vadd.f32 %v1229_v57, %v1225_v58 }
0x1247   :  { %v1872_v54 = vmul.f32 -1.442695, %v1232_v51 }
0x1248   :  { %v1873_v16 = vmul.f32 -1.442695, %v1233_v60 }
0x1249   :  { %2069 = vpow2.f32 %v1872_v54  ;;  %v1408_v54 = vld [vmem:[#allocation2] sm:$0xc0] }
0x124a   :  { %2071 = vtanh.f32 %v1233_v60 }
0x1253   :  { %v2070_v63 = vpop.eup %2069 }
0x1254   :  { %v1237_v0 = vadd.f32 1.0, %v2070_v63  ;;  %v2072_v5 = vpop.eup %2071 }
0x1256   :  { %2073 = vrcp.f32 %v1237_v0 }
0x1257   :  { %2075 = vpow2.f32 %v1873_v16 }
0x1260   :  { %v2074_v9 = vpop.eup %2073 }
0x1261   :  { %v1251_v10 = vmul.f32 %v2074_v9, %v2072_v5  ;;  %v1250_v12 = vmul.f32 %v2074_v9, %v1248_v36  ;;  %v2076_v19 = vpop.eup %2075  ;;  %v1409_v5 = vld [vmem:[#allocation2 + $0x8] sm:$0xc0] }
0x1262   :  { %v1244_v4 = vadd.f32 1.0, %v2076_v19 }
0x1263   :  { %1253 = vrot.lane.b32.xlu1 %v1251_v10, %s2154_s3 }
0x1264   :  { %2077 = vrcp.f32 %v1244_v4 }
0x126e   :  { %v2078_v6 = vpop.eup %2077 }
0x12d5   :  { %v1254_v21 = vpop.permute.xlu1 %1253 }
0x12d6   :  { %v1256_v22 = vadd.f32 %v1254_v21, %v1250_v12 }
0x12d8   :  { %2079 = vtanh.f32 %v1256_v22  ;;  %v1340_v32 = vrot.slane %v1256_v22, 6 }
0x12e2   :  { %v2080_v23 = vpop.eup %2079 }
0x12e3   :  { %v2592_v53 = vmul.f32 %v2080_v23, %v2078_v6 }
0x12e5   :  { %v1267_v8 = vpack.c.bf16 %v2592_v53, %v2592_v53 }
0x12e7   :  { %v1269_v24 = vrot.slane %v1267_v8, 1 }
0x12e9   :  { %1270 = vrot.lane.b32.xlu0 %v1269_v24, %s2154_s3 }
0x135b   :  { %v1271_v11 = vpop.permute.xlu0 %1270 }
0x135c   :  { %1876 = vmatmul.mubr.msk.bf16.vlgmr.msra.gmra.mrb[20].mxu1 %vm165_vm2, %v1271_v11 }
0x135d   :  { %1460 = vmatpush1.bf16.msra.mxu1 %v2477_v56  ;;  %1491 = vmatprep.mubr.bf16.mxu1 %v2153_v1 }
0x135e   :  { %1461 = vmatprep.subr.bf16.mxu1 %v2487_v29 }
0x1361   :  { %1462 = vmatpush1.bf16.msra.mxu1 %v2500_v61 }
0x1362   :  { %1463 = vmatprep.subr.bf16.mxu1 %v2508_v62 }
0x1365   :  { %1464 = vmatpush1.bf16.msra.mxu1 %v2528_v3 }
0x1366   :  { %1465 = vmatprep.subr.bf16.mxu1 %v2533_v7 }
0x1369   :  { %1466 = vmatpush1.bf16.msra.mxu1 %v2541_v34 }
0x136a   :  { %1632 = vmatprep.subr.bf16.mxu1 %v2469_v55 }
0x142f   :  { %v1309_v13 = vpop.f32.mrb[20].mxu1 }
0x1430   :  { %v1320_v14 = vrot.slane %v1309_v13, 4  ;;  %v1311_v25 = vpop.f32.mrb[21].mxu1 }
0x1431   :  { %v1313_v59 = vpop.f32.mrb[22].mxu1  ;;  %v1321_v18 = vrot.slane %v1311_v25, 4 }
0x1432   :  { %v1324_v26 = vadd.f32 %v1320_v14, %v1316_v15  ;;  %v1314_v2 = vpop.f32.mrb[23].mxu1 }
0x1433   :  { %v1325_v17 = vadd.f32 %v1321_v18, %v1317_v28 }
0x1434   :  { %v1877_v27 = vmul.f32 -1.442695, %v1324_v26  ;;  %v1500_v26 = vld [vmem:[#allocation2 + $0x10] sm:$0x3] }
0x1435   :  { %v1878_v38 = vmul.f32 -1.442695, %v1325_v17 }
0x1436   :  { %2081 = vpow2.f32 %v1877_v27 }
0x1437   :  { %2083 = vtanh.f32 %v1325_v17 }
0x1440   :  { %v2082_v20 = vpop.eup %2081 }
0x1441   :  { %v1329_v30 = vadd.f32 1.0, %v2082_v20  ;;  %v2084_v31 = vpop.eup %2083  ;;  %v1501_v20 = vld [vmem:[#allocation2 + $0x18] sm:$0x3] }
0x1443   :  { %2085 = vrcp.f32 %v1329_v30 }
0x1444   :  { %2087 = vpow2.f32 %v1878_v38 }
0x144d   :  { %v2086_v33 = vpop.eup %2085 }
0x144e   :  { %v1343_v35 = vmul.f32 %v2086_v33, %v2084_v31  ;;  %v1342_v37 = vmul.f32 %v2086_v33, %v1340_v32  ;;  %v2088_v39 = vpop.eup %2087 }
0x144f   :  { %v1336_v40 = vadd.f32 1.0, %v2088_v39 }
0x1450   :  { %1345 = vrot.lane.b32.xlu1 %v1343_v35, %s2154_s3 }
0x1451   :  { %2089 = vrcp.f32 %v1336_v40 }
0x145b   :  { %v2090_v44 = vpop.eup %2089 }
0x14c2   :  { %v1346_v41 = vpop.permute.xlu1 %1345 }
0x14c3   :  { %v1348_v42 = vadd.f32 %v1346_v41, %v1342_v37 }
0x14c5   :  { %2091 = vtanh.f32 %v1348_v42  ;;  %v1432_v16 = vrot.slane %v1348_v42, 6 }
0x14cf   :  { %v2092_v45 = vpop.eup %2091 }
0x14d0   :  { %v2608_v46 = vmul.f32 %v2092_v45, %v2090_v44 }
0x14d2   :  { %v1359_v47 = vpack.c.bf16 %v2608_v46, %v2608_v46 }
0x14d4   :  { %v1361_v48 = vrot.slane %v1359_v47, 2 }
0x14d6   :  { %1362 = vrot.lane.b32.xlu0 %v1361_v48, %s2154_s3 }
0x1548   :  { %v1363_v49 = vpop.permute.xlu0 %1362 }
0x1549   :  { %1881 = vmatmul.mubr.msk.bf16.vlgmr.msra.gmra.mrb[28].mxu0 %vm165_vm2, %v1363_v49 }
0x154a   :  { %1543 = vmatpush1.bf16.msra.mxu0 %v2477_v56  ;;  %1574 = vmatprep.mubr.bf16.mxu0 %v2153_v1 }
0x154b   :  { %1544 = vmatprep.subr.bf16.mxu0 %v2487_v29 }
0x154e   :  { %1545 = vmatpush1.bf16.msra.mxu0 %v2500_v61 }
0x154f   :  { %1546 = vmatprep.subr.bf16.mxu0 %v2508_v62 }
0x1552   :  { %1547 = vmatpush1.bf16.msra.mxu0 %v2528_v3 }
0x1553   :  { %1548 = vmatprep.subr.bf16.mxu0 %v2533_v7 }
0x1556   :  { %1549 = vmatpush1.bf16.msra.mxu0 %v2541_v34 }
0x1557   :  { %1722 = vmatprep.subr.bf16.mxu0 %v2469_v55 }
0x161c   :  { %v1401_v50 = vpop.f32.mrb[28].mxu0 }
0x161d   :  { %v1412_v51 = vrot.slane %v1401_v50, 2  ;;  %v1403_v52 = vpop.f32.mrb[29].mxu0 }
0x161e   :  { %v1405_v57 = vpop.f32.mrb[30].mxu0  ;;  %v1413_v0 = vrot.slane %v1403_v52, 2 }
0x161f   :  { %v1416_v58 = vadd.f32 %v1412_v51, %v1408_v54  ;;  %v1406_v60 = vpop.f32.mrb[31].mxu0 }
0x1620   :  { %v1417_v36 = vadd.f32 %v1413_v0, %v1409_v5  ;;  %v1584_v0 = vld [vmem:[#allocation2 + $0x18] sm:$0xc] }
0x1621   :  { %v1882_v63 = vmul.f32 -1.442695, %v1416_v58  ;;  %v1583_v58 = vld [vmem:[#allocation2 + $0x10] sm:$0xc] }
0x1622   :  { %v1883_v21 = vmul.f32 -1.442695, %v1417_v36 }
0x1623   :  { %2093 = vpow2.f32 %v1882_v63 }
0x1624   :  { %2095 = vtanh.f32 %v1417_v36 }
0x162d   :  { %v2094_v9 = vpop.eup %2093 }
0x162e   :  { %v1421_v10 = vadd.f32 1.0, %v2094_v9  ;;  %v2096_v12 = vpop.eup %2095 }
0x1630   :  { %2097 = vrcp.f32 %v1421_v10 }
0x1631   :  { %2099 = vpow2.f32 %v1883_v21 }
0x163a   :  { %v2098_v19 = vpop.eup %2097 }
0x163b   :  { %v1435_v55 = vmul.f32 %v2098_v19, %v2096_v12  ;;  %v1434_v4 = vmul.f32 %v2098_v19, %v1432_v16  ;;  %v2100_v22 = vpop.eup %2099 }
0x163c   :  { %v1428_v6 = vadd.f32 1.0, %v2100_v22 }
0x163d   :  { %1437 = vrot.lane.b32.xlu1 %v1435_v55, %s2154_s3 }
0x163e   :  { %2101 = vrcp.f32 %v1428_v6 }
0x1648   :  { %v2102_v24 = vpop.eup %2101 }
0x16af   :  { %v1438_v23 = vpop.permute.xlu1 %1437 }
0x16b0   :  { %v1440_v8 = vadd.f32 %v1438_v23, %v1434_v4 }
0x16b2   :  { %2103 = vtanh.f32 %v1440_v8  ;;  %v1518_v35 = vrot.slane %v1440_v8, 6 }
0x16bc   :  { %v2104_v11 = vpop.eup %2103 }
0x16bd   :  { %v2624_v13 = vmul.f32 %v2104_v11, %v2102_v24 }
0x16bf   :  { %v1451_v14 = vpack.c.bf16 %v2624_v13, %v2624_v13 }
0x16c1   :  { %v1453_v25 = vrot.slane %v1451_v14, 3 }
0x16c3   :  { %1454 = vrot.lane.b32.xlu0 %v1453_v25, %s2154_s3  ;;  %v1673_v25 = vld [vmem:[#allocation2 + $0x10] sm:$0x30] }
0x1735   :  { %v1455_v15 = vpop.permute.xlu0 %1454 }
0x1736   :  { %1886 = vmatmul.mubr.msk.bf16.vlgmr.msra.gmra.mrb[24].mxu1 %vm165_vm2, %v1455_v15 }
0x1737   :  { %1633 = vmatpush1.bf16.msra.mxu1 %v2477_v56  ;;  %1664 = vmatprep.mubr.bf16.mxu1 %v2153_v1 }
0x1738   :  { %1634 = vmatprep.subr.bf16.mxu1 %v2487_v29 }
0x173b   :  { %1635 = vmatpush1.bf16.msra.mxu1 %v2500_v61 }
0x173c   :  { %1636 = vmatprep.subr.bf16.mxu1 %v2508_v62 }
0x173f   :  { %1637 = vmatpush1.bf16.msra.mxu1 %v2528_v3 }
0x1740   :  { %1638 = vmatprep.subr.bf16.mxu1 %v2533_v7 }
0x1743   :  { %1639 = vmatpush1.bf16.msra.mxu1 %v2541_v34 }
0x1809   :  { %v1493_v59 = vpop.f32.mrb[24].mxu1 }
0x180a   :  { %v1502_v2 = vadd.f32 %v1500_v26, %v1493_v59  ;;  %v1495_v27 = vpop.f32.mrb[25].mxu1 }
0x180b   :  { %v1497_v18 = vpop.f32.mrb[26].mxu1  ;;  %v1503_v30 = vadd.f32 %v1501_v20, %v1495_v27 }
0x180c   :  { %v1887_v28 = vmul.f32 -1.442695, %v1502_v2  ;;  %v1498_v17 = vpop.f32.mrb[27].mxu1  ;;  %v1674_v18 = vld [vmem:[#allocation2 + $0x18] sm:$0x30] }
0x180d   :  { %v1888_v40 = vmul.f32 -1.442695, %v1503_v30 }
0x180e   :  { %2105 = vpow2.f32 %v1887_v28 }
0x180f   :  { %2107 = vtanh.f32 %v1503_v30 }
0x1818   :  { %v2106_v31 = vpop.eup %2105 }
0x1819   :  { %v1507_v32 = vadd.f32 1.0, %v2106_v31  ;;  %v2108_v33 = vpop.eup %2107 }
0x181b   :  { %2109 = vrcp.f32 %v1507_v32 }
0x181c   :  { %2111 = vpow2.f32 %v1888_v40 }
0x1825   :  { %v2110_v37 = vpop.eup %2109 }
0x1826   :  { %v1521_v38 = vmul.f32 %v2110_v37, %v2108_v33  ;;  %v1520_v39 = vmul.f32 %v2110_v37, %v1518_v35  ;;  %v2112_v41 = vpop.eup %2111 }
0x1827   :  { %v1514_v42 = vadd.f32 1.0, %v2112_v41 }
0x1828   :  { %1523 = vrot.lane.b32.xlu1 %v1521_v38, %s2154_s3 }
0x1829   :  { %2113 = vrcp.f32 %v1514_v42 }
0x1833   :  { %v2114_v47 = vpop.eup %2113 }
0x189a   :  { %v1524_v44 = vpop.permute.xlu1 %1523 }
0x189b   :  { %v1526_v45 = vadd.f32 %v1524_v44, %v1520_v39 }
0x189d   :  { %2115 = vtanh.f32 %v1526_v45 }
0x18a7   :  { %v2116_v48 = vpop.eup %2115 }
0x18a8   :  { %v2639_v49 = vmul.f32 %v2116_v48, %v2114_v47 }
0x18aa   :  { %v1535_v50 = vpack.c.bf16 %v2639_v49, %v2639_v49 }
0x18ac   :  { %1537 = vrot.lane.b32.xlu0 %v1535_v50, %s2154_s3 }
0x191e   :  { %v1538_v51 = vpop.permute.xlu0 %1537 }
0x191f   :  { %1891 = vmatmul.mubr.msk.bf16.vlgmr.msra.gmra.mrb[32].mxu0 %vm165_vm2, %v1538_v51 }
0x1920   :  { %1723 = vmatpush1.bf16.msra.mxu0 %v2477_v56  ;;  %1754 = vmatprep.mubr.bf16.mxu0 %v2153_v1 }
0x1921   :  { %1724 = vmatprep.subr.bf16.mxu0 %v2487_v29 }
0x1924   :  { %1725 = vmatpush1.bf16.msra.mxu0 %v2500_v61 }
0x1925   :  { %1726 = vmatprep.subr.bf16.mxu0 %v2508_v62 }
0x1928   :  { %1727 = vmatpush1.bf16.msra.mxu0 %v2528_v3 }
0x1929   :  { %1728 = vmatprep.subr.bf16.mxu0 %v2533_v7  ;;  %v1607_v7 = vrot.slane %v1526_v45, 6 }
0x192c   :  { %1729 = vmatpush1.bf16.msra.mxu0 %v2541_v34 }
0x19f2   :  { %v1576_v52 = vpop.f32.mrb[32].mxu0 }
0x19f3   :  { %v1587_v54 = vrot.slane %v1576_v52, 6  ;;  %v1578_v57 = vpop.f32.mrb[33].mxu0 }
0x19f4   :  { %v1580_v60 = vpop.f32.mrb[34].mxu0  ;;  %v1588_v29 = vrot.slane %v1578_v57, 6 }
0x19f5   :  { %v1591_v56 = vadd.f32 %v1587_v54, %v1583_v58  ;;  %v1581_v63 = vpop.f32.mrb[35].mxu0  ;;  %v1763_v54 = vld [vmem:[#allocation2 + $0x10] sm:$0xc0] }
0x19f6   :  { %v1592_v61 = vadd.f32 %v1588_v29, %v1584_v0 }
0x19f7   :  { %v1892_v1 = vmul.f32 -1.442695, %v1591_v56 }
0x19f8   :  { %v1893_v10 = vmul.f32 -1.442695, %v1592_v61 }
0x19f9   :  { %2117 = vpow2.f32 %v1892_v1  ;;  %v1764_v1 = vld [vmem:[#allocation2 + $0x18] sm:$0xc0] }
0x19fa   :  { %2119 = vtanh.f32 %v1592_v61 }
0x1a03   :  { %v2118_v5 = vpop.eup %2117 }
0x1a04   :  { %v1596_v62 = vadd.f32 1.0, %v2118_v5  ;;  %v2120_v3 = vpop.eup %2119 }
0x1a06   :  { %2121 = vrcp.f32 %v1596_v62 }
0x1a07   :  { %2123 = vpow2.f32 %v1893_v10 }
0x1a10   :  { %v2122_v36 = vpop.eup %2121 }
0x1a11   :  { %v1610_v34 = vmul.f32 %v2122_v36, %v2120_v3  ;;  %v1609_v9 = vmul.f32 %v2122_v36, %v1607_v7  ;;  %v2124_v12 = vpop.eup %2123 }
0x1a12   :  { %v1603_v16 = vadd.f32 1.0, %v2124_v12 }
0x1a13   :  { %1612 = vrot.lane.b32.xlu1 %v1610_v34, %s2154_s3 }
0x1a14   :  { %2125 = vrcp.f32 %v1603_v16 }
0x1a1e   :  { %v2126_v4 = vpop.eup %2125 }
0x1a85   :  { %v1613_v19 = vpop.permute.xlu1 %1612 }
0x1a86   :  { %v1615_v55 = vadd.f32 %v1613_v19, %v1609_v9 }
0x1a88   :  { %2127 = vtanh.f32 %v1615_v55  ;;  %v1697_v31 = vrot.slane %v1615_v55, 6 }
0x1a92   :  { %v2128_v21 = vpop.eup %2127 }
0x1a93   :  { %v2654_v22 = vmul.f32 %v2128_v21, %v2126_v4 }
0x1a95   :  { %v1624_v6 = vpack.c.bf16 %v2654_v22, %v2654_v22 }
0x1a97   :  { %v1626_v23 = vrot.slane %v1624_v6, 1 }
0x1a99   :  { %1627 = vrot.lane.b32.xlu0 %v1626_v23, %s2154_s3 }
0x1b0b   :  { %v1628_v8 = vpop.permute.xlu0 %1627 }
0x1b0c   :  { %1896 = vmatmul.mubr.msk.bf16.vlgmr.msra.gmra.mrb[28].mxu1 %vm165_vm2, %v1628_v8 }
0x1bdf   :  { %v1666_v24 = vpop.f32.mrb[28].mxu1 }
0x1be0   :  { %v1677_v11 = vrot.slane %v1666_v24, 4  ;;  %v1668_v14 = vpop.f32.mrb[29].mxu1 }
0x1be1   :  { %v1670_v15 = vpop.f32.mrb[30].mxu1  ;;  %v1678_v27 = vrot.slane %v1668_v14, 4 }
0x1be2   :  { %v1681_v59 = vadd.f32 %v1677_v11, %v1673_v25  ;;  %v1671_v26 = vpop.f32.mrb[31].mxu1 }
0x1be3   :  { %v1682_v28 = vadd.f32 %v1678_v27, %v1674_v18 }
0x1be4   :  { %v1897_v2 = vmul.f32 -1.442695, %v1681_v59 }
0x1be5   :  { %v1898_v37 = vmul.f32 -1.442695, %v1682_v28 }
0x1be6   :  { %2129 = vpow2.f32 %v1897_v2 }
0x1be7   :  { %2131 = vtanh.f32 %v1682_v28 }
0x1bf0   :  { %v2130_v17 = vpop.eup %2129 }
0x1bf1   :  { %v1686_v20 = vadd.f32 1.0, %v2130_v17  ;;  %v2132_v30 = vpop.eup %2131 }
0x1bf3   :  { %2133 = vrcp.f32 %v1686_v20 }
0x1bf4   :  { %2135 = vpow2.f32 %v1898_v37 }
0x1bfd   :  { %v2134_v32 = vpop.eup %2133 }
0x1bfe   :  { %v1700_v33 = vmul.f32 %v2134_v32, %v2132_v30  ;;  %v1699_v35 = vmul.f32 %v2134_v32, %v1697_v31  ;;  %v2136_v38 = vpop.eup %2135 }
0x1bff   :  { %v1693_v39 = vadd.f32 1.0, %v2136_v38 }
0x1c00   :  { %1702 = vrot.lane.b32.xlu1 %v1700_v33, %s2154_s3 }
0x1c01   :  { %2137 = vrcp.f32 %v1693_v39 }
0x1c0b   :  { %v2138_v42 = vpop.eup %2137 }
0x1c72   :  { %v1703_v40 = vpop.permute.xlu1 %1702 }
0x1c73   :  { %v1705_v41 = vadd.f32 %v1703_v40, %v1699_v35 }
0x1c75   :  { %2139 = vtanh.f32 %v1705_v41  ;;  %v1787_v62 = vrot.slane %v1705_v41, 6 }
0x1c7f   :  { %v2140_v44 = vpop.eup %2139 }
0x1c80   :  { %v1707_v45 = vmul.f32 %v2140_v44, %v2138_v42 }
0x1c82   :  { %v1714_v47 = vpack.c.bf16 %v1707_v45, %v1707_v45 }
0x1c84   :  { %v1716_v48 = vrot.slane %v1714_v47, 2 }
0x1c86   :  { %1717 = vrot.lane.b32.xlu0 %v1716_v48, %s2154_s3 }
0x1c8a   :  { %1170 = vrot.lane.b32.xlu0 %v2576_v43, %s2154_s3 }
0x1c8e   :  { %1352 = vrot.lane.b32.xlu0 %v2608_v46, %s2154_s3 }
0x1c92   :  { %1530 = vrot.lane.b32.xlu0 %v2639_v49, %s2154_s3 }
0x1c96   :  { %1709 = vrot.lane.b32.xlu0 %v1707_v45, %s2154_s3 }
0x1cf8   :  { %v1718_v50 = vpop.permute.xlu0 %1717 }
0x1cf9   :  { %1901 = vmatmul.mubr.msk.bf16.vlgmr.msra.gmra.mrb[36].mxu0 %vm165_vm2, %v1718_v50 }
0x1cfc   :  { %v1171_v51 = vpop.permute.xlu0 %1170 }
0x1cfd   :  { %1173 = vst.msk [vmem:[%s2749_s7] sm:$0x3] %vm240_vm6, %v1171_v51 }
0x1cfe   :  { %1870 = vst.msk [vmem:[%s2749_s7 + $0xe] sm:$0x3] %vm244_vm7, %v1171_v51 }
0x1d00   :  { %v1353_v43 = vpop.permute.xlu0 %1352 }
0x1d01   :  { %1879 = vst.msk [vmem:[%s2749_s7] sm:$0x30] %vm431_vm9, %v1353_v43 }
0x1d02   :  { %1880 = vst.msk [vmem:[%s2749_s7 + $0x6] sm:$0x30] %vm435_vm10, %v1353_v43 }
0x1d04   :  { %v1531_v12 = vpop.permute.xlu0 %1530 }
0x1d08   :  { %v1710_v4 = vpop.permute.xlu0 %1709 }
0x1dcc   :  { %v1756_v46 = vpop.f32.mrb[36].mxu0 }
0x1dcd   :  { %v1767_v49 = vrot.slane %v1756_v46, 2  ;;  %v1758_v52 = vpop.f32.mrb[37].mxu0 }
0x1dce   :  { %v1760_v57 = vpop.f32.mrb[38].mxu0  ;;  %v1768_v63 = vrot.slane %v1758_v52, 2 }
0x1dcf   :  { %v1771_v58 = vadd.f32 %v1767_v49, %v1763_v54  ;;  %v1761_v60 = vpop.f32.mrb[39].mxu0 }
0x1dd0   :  { %v1772_v29 = vadd.f32 %v1768_v63, %v1764_v1 }
0x1dd1   :  { %v1902_v56 = vmul.f32 -1.442695, %v1771_v58 }
0x1dd2   :  { %v1903_v34 = vmul.f32 -1.442695, %v1772_v29 }
0x1dd3   :  { %2141 = vpow2.f32 %v1902_v56 }
0x1dd4   :  { %2143 = vtanh.f32 %v1772_v29 }
0x1ddd   :  { %v2142_v0 = vpop.eup %2141 }
0x1dde   :  { %v1776_v61 = vadd.f32 1.0, %v2142_v0  ;;  %v2144_v5 = vpop.eup %2143 }
0x1de0   :  { %2145 = vrcp.f32 %v1776_v61 }
0x1de1   :  { %2147 = vpow2.f32 %v1903_v34 }
0x1dea   :  { %v2146_v3 = vpop.eup %2145 }
0x1deb   :  { %v1790_v7 = vmul.f32 %v2146_v3, %v2144_v5  ;;  %v1789_v36 = vmul.f32 %v2146_v3, %v1787_v62  ;;  %v2148_v9 = vpop.eup %2147 }
0x1dec   :  { %v1783_v10 = vadd.f32 1.0, %v2148_v9 }
0x1ded   :  { %1792 = vrot.lane.b32.xlu1 %v1790_v7, %s2154_s3 }
0x1dee   :  { %2149 = vrcp.f32 %v1783_v10 }
0x1df1   :  { %1260 = vrot.lane.b32.xlu1 %v2592_v53, %s2154_s3 }
0x1df5   :  { %1444 = vrot.lane.b32.xlu1 %v2624_v13, %s2154_s3 }
0x1df8   :  { %v2150_v13 = vpop.eup %2149 }
0x1df9   :  { %1619 = vrot.lane.b32.xlu1 %v2654_v22, %s2154_s3 }
0x1e5f   :  { %v1793_v16 = vpop.permute.xlu1 %1792 }
0x1e60   :  { %v1795_v19 = vadd.f32 %v1793_v16, %v1789_v36 }
0x1e62   :  { %2151 = vtanh.f32 %v1795_v19 }
0x1e63   :  { %v1261_v55 = vpop.permute.xlu1 %1260 }
0x1e64   :  { %1874 = vst.msk [vmem:[%s2749_s7] sm:$0xc] %vm335_vm12, %v1261_v55 }
0x1e65   :  { %1875 = vst.msk [vmem:[%s2749_s7 + $0xa] sm:$0xc] %vm339_vm13, %v1261_v55 }
0x1e66   :  { %1899 = vst.msk [vmem:[%s2749_s7 + $0x8] sm:$0x30] %vm431_vm9, %v1710_v4 }
0x1e67   :  { %1900 = vst.msk [vmem:[%s2749_s7 - $0x2] sm:$0x30] %vm435_vm10, %v1710_v4  ;;  %v1445_v53 = vpop.permute.xlu1 %1444 }
0x1e68   :  { %1884 = vst.msk [vmem:[%s2749_s7] sm:$0xc0] %vm527_vm15, %v1445_v53 }
0x1e69   :  { %1885 = vst.msk [vmem:[%s2749_s7 + $0x2] sm:$0xc0] %vm531_vm0, %v1445_v53 }
0x1e6a   :  { %1889 = vst.msk [vmem:[%s2749_s7 + $0x8] sm:$0x3] %vm240_vm6, %v1531_v12 }
0x1e6b   :  { %1890 = vst.msk [vmem:[%s2749_s7 + $0x6] sm:$0x3] %vm244_vm7, %v1531_v12  ;;  %v1620_v21 = vpop.permute.xlu1 %1619 }
0x1e6c   :  { %v2152_v22 = vpop.eup %2151  ;;  %1894 = vst.msk [vmem:[%s2749_s7 + $0x8] sm:$0xc] %vm335_vm12, %v1620_v21 }
0x1e6d   :  { %1895 = vst.msk [vmem:[%s2749_s7 + $0x2] sm:$0xc] %vm339_vm13, %v1620_v21  ;;  %v1797_v6 = vmul.f32 %v2152_v22, %v2150_v13 }
0x1e6f   :  { %1799 = vrot.lane.b32.xlu1 %v1797_v6, %s2154_s3 }
0x1ee1   :  { %v1800_v23 = vpop.permute.xlu1 %1799 }
0x1ee2   :  { %1904 = vst.msk [vmem:[%s2749_s7 + $0x8] sm:$0xc0] %vm527_vm15, %v1800_v23 }
0x1ee3   :  { %1803 = vst.msk [vmem:[%s2749_s7 - $0x6] sm:$0xc0] %vm531_vm0, %v1800_v23 }

</bundles_post_ra>
